<compile_context>
chip_gen: v5e
topology: v5e:2x2
jax: 0.10.0
libtpu: 0.0.40
codegen_flags: <defaults>
</compile_context>

<pallas_src>
import functools

import jax
import jax.numpy as jnp
from jax import lax
from jax.experimental import pallas as pl
from jax.experimental.pallas import tpu as pltpu


def _nonlocal_kernel(Ci, Ns_pad, TQ, needs_mask, use_bf16_exp,
                     xf_ref, wth_ref, bth_ref, wkv_ref, bkv_ref,
                     ww_ref, shift_ref, kb_ref,
                     out_ref, phi_scr, g_scr):
    q = pl.program_id(1)
    x_slab = xf_ref.at[0]                                # (C, Npad) ref view

    # ---- once per batch: pooled phi / g projections into persistent scratch
    @pl.when(q == 0)
    def _():
        xb = x_slab[...].astype(jnp.bfloat16)            # (C, Npad)
        proj = jnp.dot(wkv_ref[...], xb,
                       preferred_element_type=jnp.float32) + bkv_ref[...]

        # 2x2 max-pool == elementwise max over the 4 aligned lane blocks
        def pool(t):
            r = t[:, 0:Ns_pad]
            for j in range(1, 4):                        # static unroll
                r = jnp.maximum(r, t[:, j * Ns_pad:(j + 1) * Ns_pad])
            return r

        phi_scr[...] = pool(proj[0:Ci, :]).astype(jnp.bfloat16)
        g_scr[...] = pool(proj[Ci:2 * Ci, :]).astype(jnp.bfloat16)

    # ---- per query tile
    q0 = pl.multiple_of(q * TQ, 128)
    x_tile = x_slab[:, pl.ds(q0, TQ)]                    # (C, TQ) f32
    theta = jnp.dot(wth_ref[...], x_tile.astype(jnp.bfloat16),
                    preferred_element_type=jnp.float32) + bth_ref[...]

    # f[n, s] = sum_c theta[c, n] * phi[c, s]  -> (TQ, Ns_pad)
    f = lax.dot_general(theta.astype(jnp.bfloat16), phi_scr[...],
                        (((0,), (0,)), ((), ())),
                        preferred_element_type=jnp.float32)
    if needs_mask:
        f = f + kb_ref[...]                              # 0 real / -1e30 pad keys

    # numerically stable softmax over pooled keys; normalization deferred to y
    fm = f - jnp.max(f, axis=-1, keepdims=True)
    if use_bf16_exp:
        p = jnp.exp(fm.astype(jnp.bfloat16))             # bf16 EUP path (v6e/v7x)
        row_sum = jnp.sum(p, axis=-1, keepdims=True, dtype=jnp.float32)
    else:
        pf = jnp.exp(fm)                                 # f32 path (v5e and older)
        row_sum = jnp.sum(pf, axis=-1, keepdims=True)
        p = pf.astype(jnp.bfloat16)

    # y[n, i] = (sum_s p[n, s] * g[i, s]) / row_sum[n]  -> (TQ, Ci)
    y = lax.dot_general(p, g_scr[...],
                        (((1,), (1,)), ((), ())),
                        preferred_element_type=jnp.float32)
    y = y * pl.reciprocal(row_sum, approx=True)          # deferred normalization

    # W projection (BN scale folded into weight), shift, residual -> (C, TQ)
    wy = lax.dot_general(ww_ref[...], y.astype(jnp.bfloat16),
                         (((1,), (1,)), ((), ())),
                         preferred_element_type=jnp.float32)
    out_ref[0] = (wy + shift_ref[...] + x_tile).astype(out_ref.dtype)


def _use_bf16_exp():
    # bf16 EUP exp only on v6e / v7x; keep f32 elsewhere (v5e has no bf16 VPU/EUP).
    try:
        kind = jax.devices()[0].device_kind.lower()
    except Exception:
        return False
    return ("v6" in kind) or ("v7" in kind)


def nonlocal_block(x, params, *, tq=512):
    """x: (B, C, H, W) float32 (NCHW, H and W even)."""
    B, C, H, W = x.shape
    Ci = params["w_theta"].shape[0]
    assert H % 2 == 0 and W % 2 == 0
    assert Ci % 8 == 0, "inter_channels must be a multiple of 8 (f32 sublanes)"
    H2, W2 = H // 2, W // 2
    Ns = H2 * W2
    Ns_pad = ((Ns + 127) // 128) * 128
    Npad = 4 * Ns_pad                         # padded, permuted query axis
    TQ = min(tq, Npad)                        # Npad is always a multiple of 512
    assert Npad % TQ == 0
    NQ = Npad // TQ
    needs_mask = Ns_pad != Ns

    # layout glue: (B,C,H,W) -> (B,C,4,Ns) in (h%2, w%2, h//2, w//2) order,
    # each pool-position lane block zero-padded to a 128-lane multiple.
    xr = (x.reshape(B, C, H2, 2, W2, 2)
           .transpose(0, 1, 3, 5, 2, 4)
           .reshape(B, C, 4, Ns))
    if needs_mask:
        xr = jnp.pad(xr, ((0, 0), (0, 0), (0, 0), (0, Ns_pad - Ns)))
    x_flat = xr.reshape(B, C, Npad)
    # TODO(synk): the pre/post permutes are standalone XLA transposes (~2 extra
    # HBM round trips each); accept permuted I/O at the module boundary to drop
    # them, and pack several batches per grid step for very small C/H/W.

    # folded / fused parameters (tiny host-side math)
    w_th = params["w_theta"].astype(jnp.bfloat16)                      # (Ci, C)
    b_th = params["b_theta"][:, None].astype(jnp.float32)              # (Ci, 1)
    w_kv = jnp.concatenate([params["w_phi"], params["w_g"]],
                           axis=0).astype(jnp.bfloat16)                # (2Ci, C)
    b_kv = jnp.concatenate([params["b_phi"], params["b_g"]],
                           axis=0)[:, None].astype(jnp.float32)        # (2Ci, 1)
    bn_scale = params["bn_gamma"] / jnp.sqrt(params["bn_var"] + params["bn_eps"])
    w_Wf = (bn_scale[:, None] * params["w_W"]).astype(jnp.bfloat16)    # (C, Ci)
    shift = ((params["b_W"] - params["bn_mean"]) * bn_scale
             + params["bn_beta"])[:, None].astype(jnp.float32)         # (C, 1)
    # additive key mask row: 0 for real pooled keys, -1e30 for lane padding
    kb = jnp.where(jnp.arange(Ns_pad)[None, :] < Ns,
                   0.0, -1e30).astype(jnp.float32)                     # (1, Ns_pad)

    # VMEM budget (bytes): per-batch x slab + per-tile temporaries.
    vmem_est = (
        2 * C * Npad * 4              # resident x slab (allow 2 buffers)
        + 4 * C * TQ * 4              # output tile, double-buffered
        + 2 * Ci * Ns_pad * 2         # persistent bf16 phi / g scratch
        + 2 * Ci * Npad * 4           # transient phi/g projection at q == 0
        + 3 * TQ * Ns_pad * 4         # f / exp temporaries
        + 6 * TQ * Ci * 4             # theta / y (+ bf16 copies)
        + 2 * C * TQ * 4              # wy temp
        + (4 << 20))                  # weights, biases, headroom
    try:
        vmem_cap = int(pltpu.get_tpu_info().vmem_capacity_bytes)
    except Exception:
        vmem_cap = 64 << 20           # conservative fallback (v7x physical)
    vmem_limit = int(min(max(vmem_est, 32 << 20), (vmem_cap * 4) // 5))

    kernel = functools.partial(_nonlocal_kernel, Ci, Ns_pad, TQ,
                               needs_mask, _use_bf16_exp())

    z_flat = pl.pallas_call(
        kernel,
        out_shape=jax.ShapeDtypeStruct((B, C, Npad), jnp.float32),
        grid_spec=pltpu.PrefetchScalarGridSpec(
            num_scalar_prefetch=0,
            grid=(B, NQ),
            in_specs=[
                # x slab: constant block index across q -> DMA'd once per batch
                pl.BlockSpec((1, C, Npad), lambda b, q: (b, 0, 0)),
                pl.BlockSpec((Ci, C), lambda b, q: (0, 0)),        # theta weight
                pl.BlockSpec((Ci, 1), lambda b, q: (0, 0)),        # theta bias
                pl.BlockSpec((2 * Ci, C), lambda b, q: (0, 0)),    # phi|g weight
                pl.BlockSpec((2 * Ci, 1), lambda b, q: (0, 0)),    # phi|g bias
                pl.BlockSpec((C, Ci), lambda b, q: (0, 0)),        # W (BN-scaled)
                pl.BlockSpec((C, 1), lambda b, q: (0, 0)),         # BN shift (+b_W)
                pl.BlockSpec((1, Ns_pad), lambda b, q: (0, 0)),    # key-pad bias
            ],
            out_specs=pl.BlockSpec((1, C, TQ), lambda b, q: (b, 0, q)),
            scratch_shapes=[
                pltpu.VMEM((Ci, Ns_pad), jnp.bfloat16),            # pooled phi
                pltpu.VMEM((Ci, Ns_pad), jnp.bfloat16),            # pooled g
            ]),
        compiler_params=pltpu.CompilerParams(
            dimension_semantics=("parallel", "arbitrary"),
            vmem_limit_bytes=vmem_limit),
    )(x_flat, w_th, b_th, w_kv, b_kv, w_Wf, shift, kb)

    # glue: drop lane padding and undo the spatial permutation
    z = (z_flat.reshape(B, C, 4, Ns_pad)[..., :Ns]
               .reshape(B, C, 2, 2, H2, W2)
               .transpose(0, 1, 4, 2, 5, 3)
               .reshape(B, C, H, W))
    return z


def reference_forward(x, params):
    """Pure-JAX (f32) mirror of the PyTorch forward (eval-mode BN)."""
    B, C, H, W = x.shape
    Ci = params["w_theta"].shape[0]

    def conv1x1(inp, w, b):
        return jnp.einsum("oc,bchw->bohw", w, inp) + b[None, :, None, None]

    def pool2x2(inp):
        return inp.reshape(B, Ci, H // 2, 2, W // 2, 2).max(axis=(3, 5))

    g_x = pool2x2(conv1x1(x, params["w_g"], params["b_g"]))
    g_x = g_x.reshape(B, Ci, -1).transpose(0, 2, 1)
    theta_x = conv1x1(x, params["w_theta"], params["b_theta"])
    theta_x = theta_x.reshape(B, Ci, -1).transpose(0, 2, 1)
    phi_x = pool2x2(conv1x1(x, params["w_phi"], params["b_phi"]))
    phi_x = phi_x.reshape(B, Ci, -1)

    f = jnp.einsum("bnc,bcs->bns", theta_x, phi_x)
    f_div_C = jax.nn.softmax(f, axis=-1)
    y = jnp.einsum("bns,bsc->bnc", f_div_C, g_x)
    y = y.transpose(0, 2, 1).reshape(B, Ci, H, W)

    w_y = jnp.einsum("oc,bchw->bohw", params["w_W"], y) \
        + params["b_W"][None, :, None, None]
    scale = params["bn_gamma"] / jnp.sqrt(params["bn_var"] + params["bn_eps"])
    w_y = w_y * scale[None, :, None, None] + \
        (params["bn_beta"] - params["bn_mean"] * scale)[None, :, None, None]
    return w_y + x


def make_params(key, in_channels):
    inter = max(in_channels // 2, 1)
    ks = jax.random.split(key, 10)
    n = lambda k, s: (jax.random.normal(k, s, jnp.float32) * 0.1)
    # NOTE: the PyTorch module inits the BN gamma/beta of W to 0 (so z == x at
    # init). We use small nonzero values so the full compute path is exercised.
    return dict(
        w_g=n(ks[0], (inter, in_channels)), b_g=n(ks[1], (inter,)),
        w_theta=n(ks[2], (inter, in_channels)), b_theta=n(ks[3], (inter,)),
        w_phi=n(ks[4], (inter, in_channels)), b_phi=n(ks[5], (inter,)),
        w_W=n(ks[6], (in_channels, inter)), b_W=n(ks[7], (in_channels,)),
        bn_gamma=1.0 + n(ks[8], (in_channels,)),
        bn_beta=n(ks[9], (in_channels,)),
        bn_mean=jnp.zeros((in_channels,), jnp.float32),
        bn_var=jnp.ones((in_channels,), jnp.float32),
        bn_eps=jnp.float32(1e-5),
    )


if __name__ == "__main__":
    key = jax.random.PRNGKey(0)
    kx, kp = jax.random.split(key)
    B, C, H, W = 2, 16, 16, 16
    x = jax.random.normal(kx, (B, C, H, W), jnp.float32)
    params = make_params(kp, C)

    z = jax.jit(nonlocal_block)(x, params)
    z = jax.block_until_ready(z)

    z_ref = reference_forward(x, params)
    assert z.shape == (B, C, H, W)
    # bf16 matmul operands, approx reciprocal (f32 accumulation / softmax max &
    # sum) -> tolerance loosened accordingly vs. the pure-f32 reference.
    assert jnp.allclose(z, z_ref, rtol=1e-2, atol=1e-2), (
        float(jnp.max(jnp.abs(z - z_ref))))
    print("KERNEL_OK")
</pallas_src>

<mosaic_0001>
module attributes {stable_mosaic.version = 11 : i64} {
  func.func @_nonlocal_kernel(%arg0: i32, %arg1: i32, %arg2: memref<1x16x512xf32, #tpu.memory_space<vmem>>, %arg3: memref<8x16xbf16, #tpu.memory_space<vmem>>, %arg4: memref<8x1xf32, #tpu.memory_space<vmem>>, %arg5: memref<16x16xbf16, #tpu.memory_space<vmem>>, %arg6: memref<16x1xf32, #tpu.memory_space<vmem>>, %arg7: memref<16x8xbf16, #tpu.memory_space<vmem>>, %arg8: memref<16x1xf32, #tpu.memory_space<vmem>>, %arg9: memref<1x128xf32, #tpu.memory_space<vmem>>, %arg10: memref<1x16x512xf32, #tpu.memory_space<vmem>>, %arg11: memref<8x128xbf16, #tpu.memory_space<vmem>>, %arg12: memref<8x128xbf16, #tpu.memory_space<vmem>>) attributes {dimension_semantics = [#tpu.dimension_semantics<parallel>, #tpu.dimension_semantics<arbitrary>], iteration_bounds = array<i64: 2, 1>, scalar_prefetch = 0 : i64, scratch_operands = 2 : i64, tpu.core_type = #tpu.core_type<tc>, window_params = [{transform_indices = @transform_0, window_bounds = array<i64: 1, 16, 512>}, {pipeline_mode = #tpu.pipeline_mode<synchronous>, transform_indices = @transform_1, window_bounds = array<i64: 8, 16>}, {pipeline_mode = #tpu.pipeline_mode<synchronous>, transform_indices = @transform_2, window_bounds = array<i64: 8, 1>}, {pipeline_mode = #tpu.pipeline_mode<synchronous>, transform_indices = @transform_3, window_bounds = array<i64: 16, 16>}, {pipeline_mode = #tpu.pipeline_mode<synchronous>, transform_indices = @transform_4, window_bounds = array<i64: 16, 1>}, {pipeline_mode = #tpu.pipeline_mode<synchronous>, transform_indices = @transform_5, window_bounds = array<i64: 16, 8>}, {pipeline_mode = #tpu.pipeline_mode<synchronous>, transform_indices = @transform_6, window_bounds = array<i64: 16, 1>}, {pipeline_mode = #tpu.pipeline_mode<synchronous>, transform_indices = @transform_7, window_bounds = array<i64: 1, 128>}, {transform_indices = @transform_8, window_bounds = array<i64: 1, 16, 512>}]} {
    %c0_i32 = arith.constant 0 : i32
    %0 = arith.cmpi eq, %arg1, %c0_i32 : i32
    %1 = arith.extui %0 : i1 to i32
    %c0_i32_0 = arith.constant 0 : i32
    %c0_i32_1 = arith.constant 0 : i32
    %2 = arith.cmpi ne, %1, %c0_i32_1 : i32
    scf.if %2 {
      %44 = arith.index_cast %c0_i32_0 : i32 to index
      %c0_27 = arith.constant 0 : index
      %c0_28 = arith.constant 0 : index
      %45 = vector.load %arg2[%44, %c0_27, %c0_28] : memref<1x16x512xf32, #tpu.memory_space<vmem>>, vector<1x16x512xf32>
      %46 = vector.shape_cast %45 : vector<1x16x512xf32> to vector<16x512xf32>
      %47 = arith.truncf %46 : vector<16x512xf32> to vector<16x512xbf16>
      %c0_29 = arith.constant 0 : index
      %c0_30 = arith.constant 0 : index
      %48 = vector.load %arg5[%c0_29, %c0_30] : memref<16x16xbf16, #tpu.memory_space<vmem>>, vector<16x16xbf16>
      %cst_31 = arith.constant dense<0.000000e+00> : vector<16x512xf32>
      %49 = tpu.matmul %48, %47, %cst_31 {dimension_numbers = #tpu.dot_dimension_numbers<[1], [0], [0], [1], [0, 0, 1, 1], [], []>} : vector<16x16xbf16>, vector<16x512xbf16>, vector<16x512xf32> -> vector<16x512xf32>
      %c0_32 = arith.constant 0 : index
      %c0_33 = arith.constant 0 : index
      %50 = vector.load %arg6[%c0_32, %c0_33] : memref<16x1xf32, #tpu.memory_space<vmem>>, vector<16x1xf32>
      %51 = vector.broadcast %50 : vector<16x1xf32> to vector<16x512xf32>
      %52 = arith.addf %49, %51 : vector<16x512xf32>
      %53 = vector.extract_strided_slice %52 {offsets = [0, 0], sizes = [8, 512], strides = [1, 1]} : vector<16x512xf32> to vector<8x512xf32>
      %54 = vector.extract_strided_slice %53 {offsets = [0, 0], sizes = [8, 128], strides = [1, 1]} : vector<8x512xf32> to vector<8x128xf32>
      %55 = vector.extract_strided_slice %53 {offsets = [0, 128], sizes = [8, 128], strides = [1, 1]} : vector<8x512xf32> to vector<8x128xf32>
      %56 = arith.maximumf %54, %55 : vector<8x128xf32>
      %57 = vector.extract_strided_slice %53 {offsets = [0, 256], sizes = [8, 128], strides = [1, 1]} : vector<8x512xf32> to vector<8x128xf32>
      %58 = arith.maximumf %56, %57 : vector<8x128xf32>
      %59 = vector.extract_strided_slice %53 {offsets = [0, 384], sizes = [8, 128], strides = [1, 1]} : vector<8x512xf32> to vector<8x128xf32>
      %60 = arith.maximumf %58, %59 : vector<8x128xf32>
      %61 = arith.truncf %60 : vector<8x128xf32> to vector<8x128xbf16>
      %c0_34 = arith.constant 0 : index
      %c0_35 = arith.constant 0 : index
      %62 = vector.load %arg11[%c0_34, %c0_35] : memref<8x128xbf16, #tpu.memory_space<vmem>>, vector<8x128xbf16>
      tpu.vector_store %arg11[%c0_34, %c0_35], %61 {strides = array<i32>} : memref<8x128xbf16, #tpu.memory_space<vmem>>, vector<8x128xbf16>,
      %63 = vector.extract_strided_slice %52 {offsets = [8, 0], sizes = [8, 512], strides = [1, 1]} : vector<16x512xf32> to vector<8x512xf32>
      %64 = vector.extract_strided_slice %63 {offsets = [0, 0], sizes = [8, 128], strides = [1, 1]} : vector<8x512xf32> to vector<8x128xf32>
      %65 = vector.extract_strided_slice %63 {offsets = [0, 128], sizes = [8, 128], strides = [1, 1]} : vector<8x512xf32> to vector<8x128xf32>
      %66 = arith.maximumf %64, %65 : vector<8x128xf32>
      %67 = vector.extract_strided_slice %63 {offsets = [0, 256], sizes = [8, 128], strides = [1, 1]} : vector<8x512xf32> to vector<8x128xf32>
      %68 = arith.maximumf %66, %67 : vector<8x128xf32>
      %69 = vector.extract_strided_slice %63 {offsets = [0, 384], sizes = [8, 128], strides = [1, 1]} : vector<8x512xf32> to vector<8x128xf32>
      %70 = arith.maximumf %68, %69 : vector<8x128xf32>
      %71 = arith.truncf %70 : vector<8x128xf32> to vector<8x128xbf16>
      %c0_36 = arith.constant 0 : index
      %c0_37 = arith.constant 0 : index
      %72 = vector.load %arg12[%c0_36, %c0_37] : memref<8x128xbf16, #tpu.memory_space<vmem>>, vector<8x128xbf16>
      tpu.vector_store %arg12[%c0_36, %c0_37], %71 {strides = array<i32>} : memref<8x128xbf16, #tpu.memory_space<vmem>>, vector<8x128xbf16>,
    } else {
    }
    %c512_i32 = arith.constant 512 : i32
    %3 = arith.muli %arg1, %c512_i32 : i32
    %4 = tpu.assume_multiple %3, 128 : i32
    %c0_i32_2 = arith.constant 0 : i32
    %c0_i32_3 = arith.constant 0 : i32
    %c0_i32_4 = arith.constant 0 : i32
    %5 = tpu.memref_slice %arg2[%c0_i32_2, %c0_i32_3, %c0_i32_4] : memref<1x16x512xf32, #tpu.memory_space<vmem>> -> memref<1x16x512xf32, #tpu.memory_space<vmem>>
    %6 = tpu.memref_squeeze %5 : memref<1x16x512xf32, #tpu.memory_space<vmem>> -> memref<16x512xf32, #tpu.memory_space<vmem>>
    %c0 = arith.constant 0 : index
    %7 = arith.index_cast %4 : i32 to index
    %8 = vector.load %6[%c0, %7] : memref<16x512xf32, #tpu.memory_space<vmem>>, vector<16x512xf32>
    %c0_5 = arith.constant 0 : index
    %c0_6 = arith.constant 0 : index
    %9 = vector.load %arg3[%c0_5, %c0_6] : memref<8x16xbf16, #tpu.memory_space<vmem>>, vector<8x16xbf16>
    %10 = arith.truncf %8 : vector<16x512xf32> to vector<16x512xbf16>
    %cst = arith.constant dense<0.000000e+00> : vector<8x512xf32>
    %11 = tpu.matmul %9, %10, %cst {dimension_numbers = #tpu.dot_dimension_numbers<[1], [0], [0], [1], [0, 0, 1, 1], [], []>} : vector<8x16xbf16>, vector<16x512xbf16>, vector<8x512xf32> -> vector<8x512xf32>
    %c0_7 = arith.constant 0 : index
    %c0_8 = arith.constant 0 : index
    %12 = vector.load %arg4[%c0_7, %c0_8] : memref<8x1xf32, #tpu.memory_space<vmem>>, vector<8x1xf32>
    %13 = vector.broadcast %12 : vector<8x1xf32> to vector<8x512xf32>
    %14 = arith.addf %11, %13 : vector<8x512xf32>
    %15 = arith.truncf %14 : vector<8x512xf32> to vector<8x512xbf16>
    %c0_9 = arith.constant 0 : index
    %c0_10 = arith.constant 0 : index
    %16 = vector.load %arg11[%c0_9, %c0_10] : memref<8x128xbf16, #tpu.memory_space<vmem>>, vector<8x128xbf16>
    %cst_11 = arith.constant dense<0.000000e+00> : vector<512x128xf32>
    %17 = tpu.matmul %15, %16, %cst_11 {dimension_numbers = #tpu.dot_dimension_numbers<[0], [0], [1], [1], [0, 1, 1, 1], [], []>} : vector<8x512xbf16>, vector<8x128xbf16>, vector<512x128xf32> -> vector<512x128xf32>
    %c0_12 = arith.constant 0 : index
    %c0_13 = arith.constant 0 : index
    %18 = vector.load %arg9[%c0_12, %c0_13] : memref<1x128xf32, #tpu.memory_space<vmem>>, vector<1x128xf32>
    %19 = vector.broadcast %18 : vector<1x128xf32> to vector<512x128xf32>
    %20 = arith.addf %17, %19 : vector<512x128xf32>
    %cst_14 = arith.constant dense<0xFF800000> : vector<512xf32>
    %21 = vector.multi_reduction <maximumf>, %20, %cst_14 [1] : vector<512x128xf32> to vector<512xf32>
    %22 = vector.shape_cast %21 : vector<512xf32> to vector<512x1xf32>
    %23 = vector.broadcast %22 : vector<512x1xf32> to vector<512x128xf32>
    %24 = arith.subf %20, %23 : vector<512x128xf32>
    %25 = math.exp %24 : vector<512x128xf32>
    %cst_15 = arith.constant dense<0.000000e+00> : vector<512xf32>
    %26 = vector.multi_reduction <add>, %25, %cst_15 [1] : vector<512x128xf32> to vector<512xf32>
    %27 = vector.shape_cast %26 : vector<512xf32> to vector<512x1xf32>
    %28 = arith.truncf %25 : vector<512x128xf32> to vector<512x128xbf16>
    %c0_16 = arith.constant 0 : index
    %c0_17 = arith.constant 0 : index
    %29 = vector.load %arg12[%c0_16, %c0_17] : memref<8x128xbf16, #tpu.memory_space<vmem>>, vector<8x128xbf16>
    %cst_18 = arith.constant dense<0.000000e+00> : vector<512x8xf32>
    %30 = tpu.matmul %28, %29, %cst_18 {dimension_numbers = #tpu.dot_dimension_numbers<[1], [1], [0], [0], [0, 0, 1, 0], [], []>} : vector<512x128xbf16>, vector<8x128xbf16>, vector<512x8xf32> -> vector<512x8xf32>
    %31 = tpu.reciprocal %27 {approx = true} : vector<512x1xf32> -> vector<512x1xf32>
    %32 = vector.broadcast %31 : vector<512x1xf32> to vector<512x8xf32>
    %33 = arith.mulf %30, %32 : vector<512x8xf32>
    %c0_19 = arith.constant 0 : index
    %c0_20 = arith.constant 0 : index
    %34 = vector.load %arg7[%c0_19, %c0_20] : memref<16x8xbf16, #tpu.memory_space<vmem>>, vector<16x8xbf16>
    %35 = arith.truncf %33 : vector<512x8xf32> to vector<512x8xbf16>
    %cst_21 = arith.constant dense<0.000000e+00> : vector<16x512xf32>
    %36 = tpu.matmul %34, %35, %cst_21 {dimension_numbers = #tpu.dot_dimension_numbers<[1], [1], [0], [0], [0, 0, 1, 0], [], []>} : vector<16x8xbf16>, vector<512x8xbf16>, vector<16x512xf32> -> vector<16x512xf32>
    %c0_22 = arith.constant 0 : index
    %c0_23 = arith.constant 0 : index
    %37 = vector.load %arg8[%c0_22, %c0_23] : memref<16x1xf32, #tpu.memory_space<vmem>>, vector<16x1xf32>
    %38 = vector.broadcast %37 : vector<16x1xf32> to vector<16x512xf32>
    %39 = arith.addf %36, %38 : vector<16x512xf32>
    %40 = arith.addf %39, %8 : vector<16x512xf32>
    %c0_24 = arith.constant 0 : index
    %c0_25 = arith.constant 0 : index
    %c0_26 = arith.constant 0 : index
    %41 = vector.load %arg10[%c0_24, %c0_25, %c0_26] : memref<1x16x512xf32, #tpu.memory_space<vmem>>, vector<1x16x512xf32>
    %42 = vector.shape_cast %41 : vector<1x16x512xf32> to vector<16x512xf32>
    %43 = vector.shape_cast %40 : vector<16x512xf32> to vector<1x16x512xf32>
    tpu.vector_store %arg10[%c0_24, %c0_25, %c0_26], %43 {strides = array<i32>} : memref<1x16x512xf32, #tpu.memory_space<vmem>>, vector<1x16x512xf32>,
    return
  }
  func.func @transform_0(%arg0: i32, %arg1: i32) -> (i32, i32, i32) {
    %c0_i32 = arith.constant 0 : i32
    %c0_i32_0 = arith.constant 0 : i32
    %c0_i32_1 = arith.constant 0 : i32
    return %arg0, %c0_i32, %c0_i32_0 : i32, i32, i32
  }
  func.func @transform_1(%arg0: i32, %arg1: i32) -> (i32, i32) {
    %c0_i32 = arith.constant 0 : i32
    %c0_i32_0 = arith.constant 0 : i32
    %c0_i32_1 = arith.constant 0 : i32
    return %c0_i32, %c0_i32_0 : i32, i32
  }
  func.func @transform_2(%arg0: i32, %arg1: i32) -> (i32, i32) {
    %c0_i32 = arith.constant 0 : i32
    %c0_i32_0 = arith.constant 0 : i32
    %c0_i32_1 = arith.constant 0 : i32
    return %c0_i32, %c0_i32_0 : i32, i32
  }
  func.func @transform_3(%arg0: i32, %arg1: i32) -> (i32, i32) {
    %c0_i32 = arith.constant 0 : i32
    %c0_i32_0 = arith.constant 0 : i32
    %c0_i32_1 = arith.constant 0 : i32
    return %c0_i32, %c0_i32_0 : i32, i32
  }
  func.func @transform_4(%arg0: i32, %arg1: i32) -> (i32, i32) {
    %c0_i32 = arith.constant 0 : i32
    %c0_i32_0 = arith.constant 0 : i32
    %c0_i32_1 = arith.constant 0 : i32
    return %c0_i32, %c0_i32_0 : i32, i32
  }
  func.func @transform_5(%arg0: i32, %arg1: i32) -> (i32, i32) {
    %c0_i32 = arith.constant 0 : i32
    %c0_i32_0 = arith.constant 0 : i32
    %c0_i32_1 = arith.constant 0 : i32
    return %c0_i32, %c0_i32_0 : i32, i32
  }
  func.func @transform_6(%arg0: i32, %arg1: i32) -> (i32, i32) {
    %c0_i32 = arith.constant 0 : i32
    %c0_i32_0 = arith.constant 0 : i32
    %c0_i32_1 = arith.constant 0 : i32
    return %c0_i32, %c0_i32_0 : i32, i32
  }
  func.func @transform_7(%arg0: i32, %arg1: i32) -> (i32, i32) {
    %c0_i32 = arith.constant 0 : i32
    %c0_i32_0 = arith.constant 0 : i32
    %c0_i32_1 = arith.constant 0 : i32
    return %c0_i32, %c0_i32_0 : i32, i32
  }
  func.func @transform_8(%arg0: i32, %arg1: i32) -> (i32, i32, i32) {
    %c0_i32 = arith.constant 0 : i32
    %c0_i32_0 = arith.constant 0 : i32
    return %arg0, %c0_i32, %arg1 : i32, i32, i32
  }
}

</mosaic_0001>

<bundles_post_ra>
// kernel: nonlocal_block.1
= control target key start
LH: loop header
LB: loop body
LE: loop exit
PB: predicated region body
PF: predicated region fallthrough
CT: control target
= control target key end

     0   :  { %s2356_s27 = smov 0   ;;  %s2358_s28 = smov 0   ;;  %s3369_s0 = inlined_call_operand.vmem [shape: f32[2,16,512], index: 0, kind: input, shape index: {}]   ;;  %s3370_s1 = inlined_call_operand.vmem [shape: bf16[8,16], index: 1, kind: input, shape index: {}]   ;;  %s3371_s2 = inlined_call_operand.vmem [shape: f32[8,1], index: 2, kind: input, shape index: {}]   ;;  %s3372_s3 = inlined_call_operand.vmem [shape: bf16[16,16], index: 3, kind: input, shape index: {}]   ;;  %s3373_s4 = inlined_call_operand.vmem [shape: f32[16,1], index: 4, kind: input, shape index: {}]   ;;  %s3374_s5 = inlined_call_operand.vmem [shape: bf16[16,8], index: 5, kind: input, shape index: {}]   ;;  %s3375_s6 = inlined_call_operand.vmem [shape: f32[16,1], index: 6, kind: input, shape index: {}]   ;;  %s3376_s7 = inlined_call_operand.vmem [shape: f32[1,128], index: 7, kind: input, shape index: {}]   ;;  %s3377_s8 = inlined_call_operand.vmem [shape: f32[2,16,512], index: 8, kind: output, shape index: {}]  }
   0x1   :  { %s2360_s29 = smov 0  }
   0x2 LB: > { %s30_s30 = sadd.s32 1, %s2304_s28  ;;  %p1929_p0 = scmp.ge.s32.totalorder %s2308_s29, 1  ;;  %s2308_s29 = sphi %s2360_s29, %s18_s29   ;;  %s2304_s28 = sphi %s2358_s28, %s3411_s28   ;;  %s2300_s27 = sphi %s2356_s27, %s3410_s27  }
   0x3   : > { %p32_p1 = scmp.ge.s32.totalorder %s30_s30, 2  ;;  %p276_p2 = scmp.lt.s32.totalorder %s2308_s29, 3 }
   0x5   : > { %s3413_s30 = smov (%p32_p1, %s30_s30), 0  ;;  %p277_p3 = pnand %p1929_p0, %p276_p2 }
   0x7   : > { %280 = sbr.rel (%p277_p3) target bundleno = 1508 (0x5e4), region = 52 }
   0xc   : > { %p314_p4 = scmp.lt.s32.totalorder %s2300_s27, 1  ;;  %v453_v0 = vld [vmem:[%s3371_s2] sm:$0xff]  ;;  %v2310_v1 = vmov 0   ;;  %vm365_vm0 = vcmask 130048   ;;  %v349_v17 = vld [vmem:[%s3373_s4 + $0x8] sm:$0xff]  ;;  %vm669_vm1 = vcmask 1043456  }
   0xd   : > { %2019 = vset.pattern.permute.xlu0 %v2310_v1  ;;  %2020 = vset.pattern.permute.xlu2 %v2310_v1  ;;  %v1990_v5 = vld [vmem:[%s3372_s3] sm:$0xff]  ;;  %vm572_vm2 = vcmask 64512  }
   0xe   : > { %s3415_s27 = smov (!%p314_p4, %s2300_s27), 1  ;;  %456 = vperm.xlu0 %2019, %v453_v0   ;;  %v348_v12 = vld [vmem:[%s3373_s4] sm:$0xff]  ;;  %357 = vperm.xlu2 %2020, %v349_v17  }
   0xf   : > { %s1988_s11 = sshll.u32 %s3415_s27, 6  ;;  %v448_v15 = vld [vmem:[%s3370_s1] sm:$0xf] }
  0x10   : > { %s2385_s14 = scalar_lea.vmem %s3369_s0, %s1988_s11  ;;  %s3342_s17 = scalar_lea.vmem %s3377_s8, %s1988_s11 }
  0x11   : > { %v334_v2 = vld [vmem:[%s2385_s14] sm:$0xff]  ;;  %v335_v4 = vld [vmem:[%s2385_s14 + $0x8] sm:$0xff]  ;;  %v337_v8 = vld [vmem:[%s2385_s14 + $0x18] sm:$0xff] }
  0x12   : > { %v338_v3 = vld [vmem:[%s2385_s14 + $0x20] sm:$0xff]  ;;  %v339_v7 = vld [vmem:[%s2385_s14 + $0x28] sm:$0xff]  ;;  %v341_v9 = vld [vmem:[%s2385_s14 + $0x38] sm:$0xff] }
  0x13   : > { %v342_v6 = vpack.c.bf16 %v338_v3, %v334_v2  ;;  %v343_v10 = vpack.c.bf16 %v339_v7, %v335_v4  ;;  %v345_v11 = vpack.c.bf16 %v341_v9, %v337_v8  ;;  %v336_v13 = vld [vmem:[%s2385_s14 + $0x10] sm:$0xff] }
  0x14   : > { %v340_v14 = vld [vmem:[%s2385_s14 + $0x30] sm:$0xff] }
  0x15   : > { %376 = vmatpush.bf16.msra.mxu2 %v342_v6  ;;  %470 = vmatpush.bf16.msra.mxu0 %v342_v6  ;;  %v344_v16 = vpack.c.bf16 %v340_v14, %v336_v13 }
  0x16   : > { %390 = vmatpush.bf16.msra.mxu1 %v343_v10  ;;  %418 = vmatpush.bf16.msra.mxu3 %v345_v11 }
  0x17   : > { %352 = vperm.xlu0 %2019, %v348_v12  }
  0x18   : > { %1938 = vmatmul.msk.bf16.vlgmr.msra.gmra.mxu2 %vm365_vm0, %v1990_v5  ;;  %1942 = vmatmul.msk.bf16.vlgmr.msra.gmra.mxu0 %vm365_vm0, %v448_v15 }
  0x19   : > { %404 = vmatpush.bf16.msrb.mxu2 %v344_v16  ;;  %1939 = vmatmul.msk.bf16.vlgmr.msra.gmra.mxu1 %vm365_vm0, %v1990_v5 }
  0x1a   : > { %1941 = vmatmul.msk.bf16.vlgmr.msra.gmra.mxu3 %vm365_vm0, %v1990_v5  ;;  %483 = vmatpush.bf16.msrb.mxu1 %v343_v10 }
  0x1b   : > { %509 = vmatpush.bf16.msrb.mxu3 %v345_v11 }
  0x1d   : > { %496 = vmatpush.bf16.msra.mxu2 %v344_v16  ;;  %v2426_v16 = vld [vmem:[%s3376_s7] ss:$0 sm:$0xff] }
  0x28   : > { %1940 = vmatmul.msk.bf16.vlgmr.msrb.gmra.mxu2 %vm365_vm0, %v1990_v5 }
  0x29   : > { %1943 = vmatmul.msk.bf16.vlgmr.msrb.gmra.mxu1 %vm365_vm0, %v448_v15 }
  0x2a   : > { %1945 = vmatmul.msk.bf16.vlgmr.msrb.gmra.mxu3 %vm365_vm0, %v448_v15 }
  0x38   : > { %1944 = vmatmul.msk.bf16.vlgmr.msra.gmra.mxu2 %vm365_vm0, %v448_v15 }
  0x68   : > { %v358_v42 = vpop.permute.xlu2 %357 }
  0x80   : > { %v457_v22 = vpop.permute.xlu0 %456 }
  0x89   : > { %v353_v29 = vpop.permute.xlu0 %352 }
  0x95   : > { %v472_v18 = vpop.f32.mrf.mxu0 }
  0x96   : > { %v392_v19 = vpop.f32.mrf.mxu1  ;;  %v473_v25 = vadd.f32 %v472_v18, %v457_v22 }
  0x97   : > { %v393_v34 = vadd.f32 %v392_v19, %v353_v29 }
  0x98   : > { %v515_v30 = vpack.c.bf16 %v473_v25, %v473_v25 }
  0x9b   : > { %v378_v20 = vpop.f32.mrf.mxu2 }
  0x9c   : > { %v379_v32 = vadd.f32 %v378_v20, %v353_v29 }
  0x9d   : > { %v420_v21 = vpop.f32.mrf.mxu3  ;;  %v474_v23 = vpop.f32.mrf.mxu0 }
  0x9e   : > { %v394_v24 = vpop.f32.mrf.mxu1  ;;  %v425_v36 = vmax.f32 %v379_v32, %v393_v34  ;;  %v421_v39 = vadd.f32 %v420_v21, %v353_v29 }
  0x9f   : > { %v395_v45 = vadd.f32 %v394_v24, %v358_v42 }
  0xa3   : > { %v380_v26 = vpop.f32.mrf.mxu2 }
  0xa4   : > { %v381_v43 = vadd.f32 %v380_v26, %v358_v42 }
  0xa5   : > { %v422_v27 = vpop.f32.mrf.mxu3 }
  0xa6   : > { %v485_v28 = vpop.f32.mrf.mxu1  ;;  %v430_v48 = vmax.f32 %v381_v43, %v395_v45  ;;  %v423_v49 = vadd.f32 %v422_v27, %v358_v42 }
  0xa7   : > { %v486_v31 = vadd.f32 %v485_v28, %v457_v22 }
  0xa9   : > { %v516_v33 = vpack.c.bf16 %v486_v31, %v486_v31 }
  0xab   : > { %524 = vxpose.binary.xlu1.c.b16.start.end [1/2] (short) %v516_v33, %v515_v30, 128  ;;  %v406_v35 = vpop.f32.mrf.mxu2 }
  0xac   : > { %v407_v37 = vadd.f32 %v406_v35, %v353_v29 }
  0xad   : > { %v511_v38 = vpop.f32.mrf.mxu3 }
  0xae   : > { %v426_v40 = vmax.f32 %v425_v36, %v407_v37  ;;  %v487_v41 = vpop.f32.mrf.mxu1  ;;  %v512_v60 = vadd.f32 %v511_v38, %v457_v22 }
  0xb0   : > { %v427_v44 = vmax.f32 %v426_v40, %v421_v39  ;;  %v518_v62 = vpack.c.bf16 %v512_v60, %v512_v60 }
  0xb2   : > { %v428_v46 = vpack.c.bf16 %v427_v44, %v427_v44 }
  0xb3   : > { %v408_v47 = vpop.f32.mrf.mxu2 }
  0xb4   : > { %429 = vst [vmem:[#allocation2] sm:$0xf] %v428_v46  ;;  %v409_v50 = vadd.f32 %v408_v47, %v358_v42 }
  0xb5   : > { %v513_v51 = vpop.f32.mrf.mxu3 }
  0xb6   : > { %v431_v52 = vmax.f32 %v430_v48, %v409_v50 }
  0xb8   : > { %v432_v53 = vmax.f32 %v431_v52, %v423_v49 }
  0xba   : > { %v433_v54 = vpack.c.bf16 %v432_v53, %v432_v53 }
  0xbb   : > { %v498_v55 = vpop.f32.mrf.mxu2  ;;  %v519_v56 = vld [vmem:[#allocation2] sm:$0xf] }
  0xbc   : > { %434 = vst [vmem:[#allocation3] sm:$0xf] %v433_v54  ;;  %v671_v57 = vsel %vm669_vm1, %v519_v56, 0  ;;  %v499_v61 = vadd.f32 %v498_v55, %v457_v22 }
  0xbd   : > { %680 = vmatpush.bf16.msrb.mxu0 %v671_v57  ;;  %1992 = vmatpush.bf16.msrb.mxu2 %v671_v57 }
  0xbe   : > { %v517_v63 = vpack.c.bf16 %v499_v61, %v499_v61 }
  0xc3   : > { %v1322_v58 = vld [vmem:[#allocation3] sm:$0xf]  ;;  %v500_v59 = vpop.f32.mrf.mxu2 }
  0xc4   : > { %1330 = vmatpush.bf16.xpose.msra.mxu1 %v1322_v58  ;;  %1993 = vmatpush.bf16.xpose.msra.mxu3 %v1322_v58 }
 0x12b   : > { %548 = vxpose.binary.xlu1.c.b16.start.end [1/2] (short) %v518_v62, %v517_v63, 128 }
 0x157   : > { %v532_v0 = vpop.trf.xlu1 }
 0x158   : > { %1946 = vmatmul.msk.bf16.vlgmr.msrb.gmra.mxu0 %vm572_vm2, %v532_v0 }
 0x15f   : > { %v533_v1 = vpop.trf.xlu1 }
 0x167   : > { %v534_v2 = vpop.trf.xlu1 }
 0x168   : > { %1947 = vmatmul.msk.bf16.gmra.mxu0 %vm572_vm2, %v534_v2 }
 0x16f   : > { %v535_v3 = vpop.trf.xlu1 }
 0x177   : > { %v536_v4 = vpop.trf.xlu1 }
 0x178   : > { %1948 = vmatmul.msk.bf16.gmra.mxu0 %vm572_vm2, %v536_v4 }
 0x17f   : > { %v537_v5 = vpop.trf.xlu1 }
 0x187   : > { %v538_v6 = vpop.trf.xlu1 }
 0x188   : > { %1949 = vmatmul.msk.bf16.gmra.mxu0 %vm572_vm2, %v538_v6 }
 0x18f   : > { %v539_v7 = vpop.trf.xlu1 }
 0x197   : > { %v540_v8 = vpop.trf.xlu1 }
 0x198   : > { %1950 = vmatmul.msk.bf16.gmra.mxu0 %vm572_vm2, %v540_v8 }
 0x19f   : > { %v541_v9 = vpop.trf.xlu1 }
 0x1a7   : > { %v542_v10 = vpop.trf.xlu1 }
 0x1a8   : > { %1951 = vmatmul.msk.bf16.gmra.mxu0 %vm572_vm2, %v542_v10 }
 0x1af   : > { %v543_v11 = vpop.trf.xlu1 }
 0x1b7   : > { %v544_v12 = vpop.trf.xlu1 }
 0x1b8   : > { %1952 = vmatmul.msk.bf16.gmra.mxu0 %vm572_vm2, %v544_v12 }
 0x1bf   : > { %v545_v13 = vpop.trf.xlu1 }
 0x1c7   : > { %v546_v14 = vpop.trf.xlu1 }
 0x1c8   : > { %1953 = vmatmul.msk.bf16.gmra.mxu0 %vm572_vm2, %v546_v14 }
 0x1cf   : > { %v547_v15 = vpop.trf.xlu1 }
 0x1d5   : > { %v682_v17 = vpop.f32.mrf.mxu0 }
 0x1d6   : > { %v683_v18 = vadd.f32 %v2426_v16, %v682_v17 }
 0x1d7   : > { %v2429_v19 = vpop.trf.xlu1 }
 0x1d8   : > { %1954 = vmatmul.msk.bf16.gmra.mxu0 %vm572_vm2, %v533_v1  ;;  %842 = vmax.xlane.f32.xlu2 %v683_v18 }
 0x1dd   : > { %v684_v20 = vpop.f32.mrf.mxu0 }
 0x1de   : > { %v685_v21 = vadd.f32 %v2426_v16, %v684_v20 }
 0x1df   : > { %v2433_v22 = vpop.trf.xlu1 }
 0x1e0   : > { %844 = vmax.xlane.f32.xlu0 %v685_v21 }
 0x1e5   : > { %v687_v23 = vpop.f32.mrf.mxu0 }
 0x1e6   : > { %v2436_v24 = vadd.f32 %v2426_v16, %v687_v23 }
 0x1e7   : > { %v2438_v25 = vpop.trf.xlu1 }
 0x1e8   : > { %1955 = vmatmul.msk.bf16.gmra.mxu0 %vm572_vm2, %v535_v3  ;;  %846 = vmax.xlane.f32.xlu2 %v2436_v24 }
 0x1ed   : > { %v689_v26 = vpop.f32.mrf.mxu0 }
 0x1ee   : > { %v2443_v27 = vadd.f32 %v2426_v16, %v689_v26 }
 0x1ef   : > { %v2445_v28 = vpop.trf.xlu1 }
 0x1f0   : > { %848 = vmax.xlane.f32.xlu2 %v2443_v27 }
 0x1f5   : > { %v692_v29 = vpop.f32.mrf.mxu0 }
 0x1f6   : > { %v2449_v30 = vadd.f32 %v2426_v16, %v692_v29 }
 0x1f7   : > { %v2451_v31 = vpop.trf.xlu1 }
 0x1f8   : > { %1956 = vmatmul.msk.bf16.gmra.mxu0 %vm572_vm2, %v537_v5  ;;  %850 = vmax.xlane.f32.xlu0 %v2449_v30 }
 0x1fd   : > { %v694_v32 = vpop.f32.mrf.mxu0 }
 0x1fe   : > { %v2456_v33 = vadd.f32 %v2426_v16, %v694_v32 }
 0x1ff   : > { %v2458_v34 = vpop.trf.xlu1 }
 0x200   : > { %852 = vmax.xlane.f32.xlu2 %v2456_v33 }
 0x205   : > { %v697_v35 = vpop.f32.mrf.mxu0 }
 0x206   : > { %v2462_v36 = vadd.f32 %v2426_v16, %v697_v35 }
 0x207   : > { %v2464_v37 = vpop.trf.xlu1 }
 0x208   : > { %1957 = vmatmul.msk.bf16.gmra.mxu0 %vm572_vm2, %v539_v7  ;;  %854 = vmax.xlane.f32.xlu0 %v2462_v36 }
 0x20d   : > { %v699_v38 = vpop.f32.mrf.mxu0 }
 0x20e   : > { %v2469_v39 = vadd.f32 %v2426_v16, %v699_v38 }
 0x20f   : > { %v2471_v40 = vpop.trf.xlu1 }
 0x210   : > { %856 = vmax.xlane.f32.xlu2 %v2469_v39 }
 0x215   : > { %v2474_v41 = vpop.f32.mrf.mxu0 }
 0x217   : > { %v564_v42 = vpop.trf.xlu1 }
 0x218   : > { %1958 = vmatmul.msk.bf16.gmra.mxu0 %vm572_vm2, %v541_v9  ;;  %1966 = vmatmul.msk.bf16.vlgmr.msrb.gmra.mxu2 %vm572_vm2, %v564_v42 }
 0x21d   : > { %v2478_v43 = vpop.f32.mrf.mxu0 }
 0x21f   : > { %v2480_v44 = vpop.trf.xlu1 }
 0x225   : > { %v2482_v45 = vpop.f32.mrf.mxu0 }
 0x227   : > { %v566_v46 = vpop.trf.xlu1 }
 0x228   : > { %1959 = vmatmul.msk.bf16.gmra.mxu0 %vm572_vm2, %v543_v11  ;;  %1967 = vmatmul.msk.bf16.gmra.mxu2 %vm572_vm2, %v566_v46 }
 0x22d   : > { %v2486_v47 = vpop.f32.mrf.mxu0 }
 0x22f   : > { %v2488_v48 = vpop.trf.xlu1 }
 0x235   : > { %v2490_v49 = vpop.f32.mrf.mxu0 }
 0x237   : > { %v568_v50 = vpop.trf.xlu1 }
 0x238   : > { %1960 = vmatmul.msk.bf16.gmra.mxu0 %vm572_vm2, %v545_v13  ;;  %1968 = vmatmul.msk.bf16.gmra.mxu2 %vm572_vm2, %v568_v50 }
 0x23d   : > { %v2494_v51 = vpop.f32.mrf.mxu0 }
 0x23f   : > { %v2496_v52 = vpop.trf.xlu1 }
 0x245   : > { %v2498_v53 = vpop.f32.mrf.mxu0 }
 0x247   : > { %v570_v54 = vpop.trf.xlu1 }
 0x248   : > { %1961 = vmatmul.msk.bf16.gmra.mxu0 %vm572_vm2, %v547_v15  ;;  %1969 = vmatmul.msk.bf16.gmra.mxu2 %vm572_vm2, %v570_v54 }
 0x24b   : > { %v843_v55 = vpop.xlane.xlu2 %842 }
 0x24c   : > { %v970_v58 = vsub.f32 %v683_v18, %v843_v55 }
 0x24d   : > { %v719_v56 = vpop.f32.mrf.mxu0 }
 0x24e   : > { %v2503_v57 = vadd.f32 %v2426_v16, %v719_v56  ;;  %v1034_v59 = vmul.f32 1.442695, %v970_v58 }
 0x24f   : > { %v571_v55 = vpop.trf.xlu1 }
 0x250   : > { %872 = vmax.xlane.f32.xlu1 %v2503_v57  ;;  %2022 = vpow2.f32 %v1034_v59 }
 0x253   : > { %v845_v60 = vpop.xlane.xlu0 %844 }
 0x254   : > { %v971_v61 = vsub.f32 %v685_v21, %v845_v60 }
 0x255   : > { %v2506_v62 = vpop.f32.mrf.mxu0 }
 0x256   : > { %v1036_v63 = vmul.f32 1.442695, %v971_v61  ;;  %v2512_v1 = vpop.eup %2022 }
 0x257   : > { %3388 = vst [vmem:[#allocation4_spill] sm:$0xff] %v2512_v1 }
 0x258   : > { %2024 = vpow2.f32 %v1036_v63  ;;  %1962 = vmatmul.msk.bf16.gmra.mxu0 %vm572_vm2, %v2429_v19  ;;  %1970 = vmatmul.msk.bf16.gmra.mxu2 %vm572_vm2, %v2433_v22 }
 0x25b   : > { %v847_v0 = vpop.xlane.xlu2 %846 }
 0x25c   : > { %v972_v4 = vsub.f32 %v2436_v24, %v847_v0 }
 0x25d   : > { %v2514_v2 = vpop.f32.mrf.mxu0 }
 0x25e   : > { %v2516_v3 = vpop.eup %2024  ;;  %v1038_v6 = vmul.f32 1.442695, %v972_v4 }
 0x25f   : > { %3389 = vst [vmem:[#allocation5_spill] sm:$0xff] %v2516_v3  ;;  %v1290_v5 = vpack.c.bf16 %v2516_v3, %v2512_v1 }
 0x260   : > { %2026 = vpow2.f32 %v1038_v6 }
 0x261   : > { %1331 = vmatmul.bf16.vlgmr.msra.gmra.mxu1 %v1290_v5 }
 0x263   : > { %v849_v7 = vpop.xlane.xlu2 %848 }
 0x264   : > { %v973_v8 = vsub.f32 %v2443_v27, %v849_v7 }
 0x265   : > { %v2522_v9 = vpop.f32.mrf.mxu0 }
 0x266   : > { %v1040_v10 = vmul.f32 1.442695, %v973_v8  ;;  %v2528_v12 = vpop.eup %2026 }
 0x267   : > { %3390 = vst [vmem:[#allocation6_spill] sm:$0xff] %v2528_v12 }
 0x268   : > { %2028 = vpow2.f32 %v1040_v10  ;;  %1963 = vmatmul.msk.bf16.gmra.mxu0 %vm572_vm2, %v2438_v25  ;;  %1971 = vmatmul.msk.bf16.gmra.mxu2 %vm572_vm2, %v2445_v28  ;;  %v2609_v10 = vadd.f32 %v2426_v16, %v2474_v41 }
 0x26b   : > { %v851_v11 = vpop.xlane.xlu0 %850 }
 0x26c   : > { %v974_v15 = vsub.f32 %v2449_v30, %v851_v11 }
 0x26d   : > { %v2530_v13 = vpop.f32.mrf.mxu0 }
 0x26e   : > { %v2532_v14 = vpop.eup %2028  ;;  %v1042_v18 = vmul.f32 1.442695, %v974_v15 }
 0x26f   : > { %3391 = vst [vmem:[#allocation7_spill] sm:$0xff] %v2532_v14  ;;  %v1291_v17 = vpack.c.bf16 %v2532_v14, %v2528_v12 }
 0x270   : > { %2030 = vpow2.f32 %v1042_v18  ;;  %v2621_v18 = vadd.f32 %v2426_v16, %v2478_v43 }
 0x271   : > { %1336 = vmatmul.bf16.gmra.mxu1 %v1291_v17 }
 0x273   : > { %v853_v19 = vpop.xlane.xlu2 %852 }
 0x274   : > { %v975_v20 = vsub.f32 %v2456_v33, %v853_v19  ;;  %v2627_v19 = vadd.f32 %v2426_v16, %v2482_v45  ;;  %v2645_v45 = vadd.f32 %v2426_v16, %v2490_v49  ;;  %v2663_v49 = vadd.f32 %v2426_v16, %v2498_v53 }
 0x275   : > { %v2538_v21 = vpop.f32.mrf.mxu0 }
 0x276   : > { %v1044_v22 = vmul.f32 1.442695, %v975_v20  ;;  %v2544_v24 = vpop.eup %2030 }
 0x277   : > { %3392 = vst [vmem:[#allocation8_spill] sm:$0xff] %v2544_v24 }
 0x278   : > { %2032 = vpow2.f32 %v1044_v22  ;;  %1964 = vmatmul.msk.bf16.gmra.mxu0 %vm572_vm2, %v2451_v31  ;;  %1972 = vmatmul.msk.bf16.gmra.mxu2 %vm572_vm2, %v2458_v34 }
 0x27b   : > { %v855_v23 = vpop.xlane.xlu0 %854 }
 0x27c   : > { %v976_v27 = vsub.f32 %v2462_v36, %v855_v23  ;;  %v2639_v23 = vadd.f32 %v2426_v16, %v2486_v47  ;;  %v2657_v47 = vadd.f32 %v2426_v16, %v2494_v51 }
 0x27d   : > { %v2546_v25 = vpop.f32.mrf.mxu0 }
 0x27e   : > { %v2548_v26 = vpop.eup %2032  ;;  %v1046_v29 = vmul.f32 1.442695, %v976_v27 }
 0x27f   : > { %v1292_v28 = vpack.c.bf16 %v2548_v26, %v2544_v24 }
 0x280   : > { %2034 = vpow2.f32 %v1046_v29 }
 0x281   : > { %1341 = vmatmul.bf16.gmra.mxu1 %v1292_v28 }
 0x283   : > { %v857_v30 = vpop.xlane.xlu2 %856 }
 0x284   : > { %v977_v31 = vsub.f32 %v2469_v39, %v857_v30 }
 0x285   : > { %v2554_v32 = vpop.f32.mrf.mxu0 }
 0x286   : > { %v1048_v33 = vmul.f32 1.442695, %v977_v31  ;;  %v2560_v34 = vpop.eup %2034 }
 0x288   : > { %2036 = vpow2.f32 %v1048_v33  ;;  %1965 = vmatmul.msk.bf16.gmra.mxu0 %vm572_vm2, %v2464_v37  ;;  %1973 = vmatmul.msk.bf16.gmra.mxu2 %vm572_vm2, %v2471_v40 }
 0x28d   : > { %v2562_v35 = vpop.f32.mrf.mxu0 }
 0x28e   : > { %v2564_v36 = vpop.eup %2036 }
 0x28f   : > { %v1293_v38 = vpack.c.bf16 %v2564_v36, %v2560_v34 }
 0x291   : > { %1346 = vmatmul.bf16.gmra.mxu1 %v1293_v38 }
 0x295   : > { %v2568_v39 = vpop.f32.mrf.mxu0 }
 0x298   : > { %1974 = vmatmul.msk.bf16.gmra.mxu2 %vm572_vm2, %v2480_v44 }
 0x29d   : > { %v2572_v42 = vpop.f32.mrf.mxu0 }
 0x2a5   : > { %v2574_v37 = vpop.f32.mrf.mxu0 }
 0x2a8   : > { %1975 = vmatmul.msk.bf16.gmra.mxu2 %vm572_vm2, %v2488_v48  ;;  %v782_v48 = vpop.f32.mrf.mxu2 }
 0x2a9   : > { %v2617_v17 = vadd.f32 %v2426_v16, %v782_v48  ;;  %v2684_v48 = vadd.f32 %v2426_v16, %v2514_v2  ;;  %v2702_v2 = vadd.f32 %v2426_v16, %v2530_v13  ;;  %v2716_v13 = vadd.f32 %v2426_v16, %v2538_v21 }
 0x2ad   : > { %v2578_v40 = vpop.f32.mrf.mxu0 }
 0x2b0   : > { %v784_v60 = vpop.f32.mrf.mxu2 }
 0x2b1   : > { %v2630_v20 = vadd.f32 %v2426_v16, %v784_v60 }
 0x2b5   : > { %v2580_v46 = vpop.f32.mrf.mxu0 }
 0x2b8   : > { %1976 = vmatmul.msk.bf16.gmra.mxu2 %vm572_vm2, %v2496_v52  ;;  %v787_v52 = vpop.f32.mrf.mxu2 }
 0x2b9   : > { %v2635_v43 = vadd.f32 %v2426_v16, %v787_v52 }
 0x2bd   : > { %v2584_v50 = vpop.f32.mrf.mxu0 }
 0x2c0   : > { %v789_v0 = vpop.f32.mrf.mxu2 }
 0x2c1   : > { %v2648_v28 = vadd.f32 %v2426_v16, %v789_v0 }
 0x2c5   : > { %v2586_v54 = vpop.f32.mrf.mxu0 }
 0x2c8   : > { %1977 = vmatmul.msk.bf16.gmra.mxu2 %vm572_vm2, %v571_v55  ;;  %v792_v6 = vpop.f32.mrf.mxu2  ;;  %v2680_v55 = vadd.f32 %v2426_v16, %v2506_v62  ;;  %v2698_v62 = vadd.f32 %v2426_v16, %v2522_v9 }
 0x2c9   : > { %v2653_v29 = vadd.f32 %v2426_v16, %v792_v6 }
 0x2cd   : > { %v2589_v44 = vpop.f32.mrf.mxu0 }
 0x2d0   : > { %v794_v15 = vpop.f32.mrf.mxu2 }
 0x2d1   : > { %v2666_v31 = vadd.f32 %v2426_v16, %v794_v15  ;;  %v2720_v15 = vadd.f32 %v2426_v16, %v2546_v25  ;;  %v2734_v25 = vadd.f32 %v2426_v16, %v2554_v32 }
 0x2d5   : > { %v2591_v56 = vpop.f32.mrf.mxu0 }
 0x2d8   : > { %v797_v41 = vpop.f32.mrf.mxu2 }
 0x2d9   : > { %v2671_v51 = vadd.f32 %v2426_v16, %v797_v41 }
 0x2dd   : > { %v2593_v58 = vpop.f32.mrf.mxu0 }
 0x2e0   : > { %v799_v22 = vpop.f32.mrf.mxu2 }
 0x2e1   : > { %v2674_v38 = vadd.f32 %v2426_v16, %v799_v22 }
 0x2e5   : > { %v2595_v59 = vpop.f32.mrf.mxu0 }
 0x2e8   : > { %v802_v27 = vpop.f32.mrf.mxu2 }
 0x2e9   : > { %v2689_v60 = vadd.f32 %v2426_v16, %v802_v27 }
 0x2ed   : > { %v2597_v61 = vpop.f32.mrf.mxu0 }
 0x2f0   : > { %v804_v30 = vpop.f32.mrf.mxu2 }
 0x2f1   : > { %v2692_v52 = vadd.f32 %v2426_v16, %v804_v30  ;;  %v2738_v30 = vadd.f32 %v2426_v16, %v2562_v35 }
 0x2f5   : > { %v2599_v63 = vpop.f32.mrf.mxu0 }
 0x2f8   : > { %v807_v33 = vpop.f32.mrf.mxu2 }
 0x2f9   : > { %v2707_v6 = vadd.f32 %v2426_v16, %v807_v33 }
 0x2fd   : > { %v2601_v4 = vpop.f32.mrf.mxu0 }
 0x300   : > { %v809_v53 = vpop.f32.mrf.mxu2 }
 0x305   : > { %v777_v5 = vpop.f32.mrf.mxu0 }
 0x306   : > { %v2604_v7 = vadd.f32 %v2426_v16, %v777_v5 }
 0x308   : > { %918 = vmax.xlane.f32.xlu0 %v2604_v7  ;;  %v812_v0 = vpop.f32.mrf.mxu2 }
 0x309   : > { %v2725_v22 = vadd.f32 %v2426_v16, %v812_v0 }
 0x30d   : > { %v779_v8 = vpop.f32.mrf.mxu0 }
 0x30e   : > { %v2612_v11 = vadd.f32 %v2426_v16, %v779_v8  ;;  %v2710_v8 = vadd.f32 %v2426_v16, %v809_v53 }
 0x310   : > { %858 = vmax.xlane.f32.xlu0 %v2609_v10  ;;  %920 = vmax.xlane.f32.xlu2 %v2612_v11  ;;  %v814_v5 = vpop.f32.mrf.mxu2 }
 0x311   : > { %v2728_v27 = vadd.f32 %v2426_v16, %v814_v5 }
 0x318   : > { %922 = vmax.xlane.f32.xlu0 %v2617_v17  ;;  %860 = vmax.xlane.f32.xlu2 %v2621_v18  ;;  %v817_v9 = vpop.f32.mrf.mxu2 }
 0x319   : > { %v2745_v12 = vadd.f32 %v2426_v16, %v817_v9 }
 0x320   : > { %862 = vmax.xlane.f32.xlu0 %v2627_v19  ;;  %924 = vmax.xlane.f32.xlu2 %v2630_v20  ;;  %v819_v41 = vpop.f32.mrf.mxu2 }
 0x321   : > { %v2748_v32 = vadd.f32 %v2426_v16, %v819_v41  ;;  %v2758_v41 = vadd.f32 %v2426_v16, %v2568_v39 }
 0x328   : > { %926 = vmax.xlane.f32.xlu0 %v2635_v43  ;;  %864 = vmax.xlane.f32.xlu2 %v2639_v23  ;;  %v822_v33 = vpop.f32.mrf.mxu2 }
 0x330   : > { %866 = vmax.xlane.f32.xlu0 %v2645_v45  ;;  %928 = vmax.xlane.f32.xlu2 %v2648_v28  ;;  %v824_v14 = vpop.f32.mrf.mxu2 }
 0x338   : > { %930 = vmax.xlane.f32.xlu0 %v2653_v29  ;;  %868 = vmax.xlane.f32.xlu2 %v2657_v47  ;;  %v827_v39 = vpop.f32.mrf.mxu2 }
 0x340   : > { %870 = vmax.xlane.f32.xlu0 %v2663_v49  ;;  %932 = vmax.xlane.f32.xlu2 %v2666_v31 }
 0x348   : > { %936 = vmax.xlane.f32.xlu0 %v2674_v38  ;;  %934 = vmax.xlane.f32.xlu2 %v2671_v51 }
 0x350   : > { %876 = vmax.xlane.f32.xlu0 %v2684_v48  ;;  %874 = vmax.xlane.f32.xlu2 %v2680_v55 }
 0x358   : > { %940 = vmax.xlane.f32.xlu0 %v2692_v52  ;;  %938 = vmax.xlane.f32.xlu2 %v2689_v60 }
 0x360   : > { %880 = vmax.xlane.f32.xlu0 %v2702_v2  ;;  %878 = vmax.xlane.f32.xlu2 %v2698_v62 }
 0x368   : > { %944 = vmax.xlane.f32.xlu0 %v2710_v8  ;;  %942 = vmax.xlane.f32.xlu2 %v2707_v6 }
 0x370   : > { %884 = vmax.xlane.f32.xlu0 %v2720_v15  ;;  %882 = vmax.xlane.f32.xlu2 %v2716_v13 }
 0x378   : > { %948 = vmax.xlane.f32.xlu0 %v2728_v27  ;;  %946 = vmax.xlane.f32.xlu2 %v2725_v22 }
 0x37b   : > { %v919_v21 = vpop.xlane.xlu0 %918 }
 0x37c   : > { %v1008_v53 = vsub.f32 %v2604_v7, %v919_v21 }
 0x37e   : > { %v1110_v3 = vmul.f32 1.442695, %v1008_v53 }
 0x380   : > { %888 = vmax.xlane.f32.xlu0 %v2738_v30  ;;  %886 = vmax.xlane.f32.xlu2 %v2734_v25  ;;  %2038 = vpow2.f32 %v1110_v3 }
 0x383   : > { %v859_v0 = vpop.xlane.xlu0 %858  ;;  %v921_v5 = vpop.xlane.xlu2 %920 }
 0x384   : > { %v1009_v1 = vsub.f32 %v2612_v11, %v921_v5  ;;  %v978_v7 = vsub.f32 %v2609_v10, %v859_v0 }
 0x386   : > { %v1112_v35 = vmul.f32 1.442695, %v1009_v1  ;;  %v1050_v24 = vmul.f32 1.442695, %v978_v7  ;;  %v2754_v9 = vpop.eup %2038  ;;  %v2762_v1 = vadd.f32 %v2426_v16, %v2572_v42 }
 0x387   : > { %3393 = vst [vmem:[#allocation9_spill] sm:$0xff] %v2754_v9 }
 0x388   : > { %952 = vmax.xlane.f32.xlu0 %v2748_v32  ;;  %950 = vmax.xlane.f32.xlu2 %v2745_v12  ;;  %2040 = vpow2.f32 %v1112_v35 }
 0x389   : > { %2042 = vpow2.f32 %v1050_v24  ;;  %v2775_v24 = vadd.f32 %v2426_v16, %v822_v33 }
 0x38b   : > { %v923_v21 = vpop.xlane.xlu0 %922  ;;  %v861_v53 = vpop.xlane.xlu2 %860 }
 0x38c   : > { %v979_v11 = vsub.f32 %v2621_v18, %v861_v53  ;;  %v1010_v0 = vsub.f32 %v2617_v17, %v923_v21  ;;  %v2778_v17 = vadd.f32 %v2426_v16, %v824_v14 }
 0x38e   : > { %v1052_v3 = vmul.f32 1.442695, %v979_v11  ;;  %v2764_v10 = vpop.eup %2040  ;;  %v1114_v42 = vmul.f32 1.442695, %v1010_v0 }
 0x38f   : > { %3394 = vst [vmem:[#allocation10_spill] sm:$0xff] %v2764_v10  ;;  %v1309_v18 = vpack.c.bf16 %v2764_v10, %v2754_v9  ;;  %v2772_v53 = vpop.eup %2042 }
 0x390   : > { %892 = vmax.xlane.f32.xlu0 %v2762_v1  ;;  %890 = vmax.xlane.f32.xlu2 %v2758_v41  ;;  %2044 = vpow2.f32 %v1052_v3 }
 0x391   : > { %1426 = vmatmul.bf16.vlgmr.msra.gmra.mxu3 %v1309_v18  ;;  %2046 = vpow2.f32 %v1114_v42  ;;  %v829_v18 = vpop.f32.mrf.mxu2 }
 0x393   : > { %v863_v5 = vpop.xlane.xlu0 %862  ;;  %v925_v35 = vpop.xlane.xlu2 %924 }
 0x394   : > { %v1011_v7 = vsub.f32 %v2630_v20, %v925_v35  ;;  %v980_v3 = vsub.f32 %v2627_v19, %v863_v5  ;;  %v2792_v19 = vadd.f32 %v2426_v16, %v2574_v37  ;;  %v2796_v5 = vadd.f32 %v2426_v16, %v2578_v40 }
 0x396   : > { %v1116_v21 = vmul.f32 1.442695, %v1011_v7  ;;  %v2780_v11 = vpop.eup %2044  ;;  %v1054_v14 = vmul.f32 1.442695, %v980_v3 }
 0x397   : > { %v1294_v20 = vpack.c.bf16 %v2780_v11, %v2772_v53  ;;  %v2788_v7 = vpop.eup %2046 }
 0x398   : > { %956 = vmax.xlane.f32.xlu0 %v2778_v17  ;;  %954 = vmax.xlane.f32.xlu2 %v2775_v24  ;;  %2048 = vpow2.f32 %v1116_v21 }
 0x399   : > { %1351 = vmatmul.bf16.gmra.mxu1 %v1294_v20  ;;  %2050 = vpow2.f32 %v1054_v14  ;;  %v2809_v14 = vadd.f32 %v2426_v16, %v827_v39 }
 0x39b   : > { %v927_v33 = vpop.xlane.xlu0 %926  ;;  %v865_v0 = vpop.xlane.xlu2 %864 }
 0x39c   : > { %v981_v35 = vsub.f32 %v2639_v23, %v865_v0  ;;  %v1012_v21 = vsub.f32 %v2635_v43, %v927_v33  ;;  %v2812_v43 = vadd.f32 %v2426_v16, %v829_v18  ;;  %v832_v33 = vpop.f32.mrf.mxu2 }
 0x39e   : > { %v1056_v42 = vmul.f32 1.442695, %v981_v35  ;;  %v2798_v9 = vpop.eup %2048  ;;  %v1118_v20 = vmul.f32 1.442695, %v1012_v21 }
 0x39f   : > { %3395 = vst [vmem:[#allocation11_spill] sm:$0xff] %v2798_v9  ;;  %v1310_v23 = vpack.c.bf16 %v2798_v9, %v2788_v7  ;;  %v2806_v0 = vpop.eup %2050 }
 0x3a0   : > { %896 = vmax.xlane.f32.xlu0 %v2796_v5  ;;  %894 = vmax.xlane.f32.xlu2 %v2792_v19  ;;  %2052 = vpow2.f32 %v1056_v42 }
 0x3a1   : > { %1431 = vmatmul.bf16.gmra.mxu3 %v1310_v23  ;;  %2054 = vpow2.f32 %v1118_v20  ;;  %v2826_v20 = vadd.f32 %v2426_v16, %v2580_v46 }
 0x3a3   : > { %v867_v37 = vpop.xlane.xlu0 %866  ;;  %v929_v3 = vpop.xlane.xlu2 %928  ;;  %3396 = vst [vmem:[#allocation12_spill] sm:$0xff] %v2826_v20 }
 0x3a4   : > { %v1013_v40 = vsub.f32 %v2648_v28, %v929_v3  ;;  %v982_v42 = vsub.f32 %v2645_v45, %v867_v37  ;;  %v2830_v45 = vadd.f32 %v2426_v16, %v2584_v50 }
 0x3a6   : > { %v1120_v35 = vmul.f32 1.442695, %v1013_v40  ;;  %v2814_v10 = vpop.eup %2052  ;;  %v1058_v18 = vmul.f32 1.442695, %v982_v42  ;;  %3397 = vst [vmem:[#allocation13_spill] sm:$0xff] %v2830_v45 }
 0x3a7   : > { %v1295_v28 = vpack.c.bf16 %v2814_v10, %v2806_v0  ;;  %v2822_v3 = vpop.eup %2054 }
 0x3a8   : > { %960 = vmax.xlane.f32.xlu0 %v2812_v43  ;;  %958 = vmax.xlane.f32.xlu2 %v2809_v14  ;;  %2056 = vpow2.f32 %v1120_v35  ;;  %v834_v35 = vpop.f32.mrf.mxu2 }
 0x3a9   : > { %1356 = vmatmul.bf16.gmra.mxu1 %v1295_v28  ;;  %2058 = vpow2.f32 %v1058_v18  ;;  %v2843_v18 = vadd.f32 %v2426_v16, %v832_v33 }
 0x3ab   : > { %v931_v39 = vpop.xlane.xlu0 %930  ;;  %v869_v21 = vpop.xlane.xlu2 %868 }
 0x3ac   : > { %v983_v23 = vsub.f32 %v2657_v47, %v869_v21  ;;  %v1014_v28 = vsub.f32 %v2653_v29, %v931_v39  ;;  %v2846_v29 = vadd.f32 %v2426_v16, %v834_v35 }
 0x3ae   : > { %v1060_v37 = vmul.f32 1.442695, %v983_v23  ;;  %v2832_v40 = vpop.eup %2056  ;;  %v1122_v50 = vmul.f32 1.442695, %v1014_v28  ;;  %v873_v23 = vpop.xlane.xlu1 %872 }
 0x3af   : > { %v1311_v47 = vpack.c.bf16 %v2832_v40, %v2822_v3  ;;  %v2840_v9 = vpop.eup %2058 }
 0x3b0   : > { %900 = vmax.xlane.f32.xlu0 %v2830_v45  ;;  %898 = vmax.xlane.f32.xlu2 %v2826_v20  ;;  %2060 = vpow2.f32 %v1060_v37 }
 0x3b1   : > { %1436 = vmatmul.bf16.gmra.mxu3 %v1311_v47  ;;  %v985_v47 = vsub.f32 %v2503_v57, %v873_v23  ;;  %2062 = vpow2.f32 %v1122_v50  ;;  %v2861_v57 = vadd.f32 %v2426_v16, %v2586_v54 }
 0x3b3   : > { %v871_v46 = vpop.xlane.xlu0 %870  ;;  %v933_v42 = vpop.xlane.xlu2 %932 }
 0x3b4   : > { %v1015_v21 = vsub.f32 %v2666_v31, %v933_v42  ;;  %v984_v37 = vsub.f32 %v2663_v49, %v871_v46  ;;  %v837_v31 = vpop.f32.mrf.mxu2  ;;  %v2865_v46 = vadd.f32 %v2426_v16, %v2589_v44 }
 0x3b6   : > { %v1124_v39 = vmul.f32 1.442695, %v1015_v21  ;;  %v2848_v20 = vpop.eup %2060  ;;  %v1062_v35 = vmul.f32 1.442695, %v984_v37  ;;  %v1064_v21 = vmul.f32 1.442695, %v985_v47 }
 0x3b7   : > { %v1296_v33 = vpack.c.bf16 %v2848_v20, %v2840_v9  ;;  %v2857_v49 = vpop.eup %2062 }
 0x3b8   : > { %964 = vmax.xlane.f32.xlu0 %v2846_v29  ;;  %962 = vmax.xlane.f32.xlu2 %v2843_v18  ;;  %2064 = vpow2.f32 %v1124_v39 }
 0x3b9   : > { %1361 = vmatmul.bf16.gmra.mxu1 %v1296_v33  ;;  %2066 = vpow2.f32 %v1062_v35 }
 0x3ba   : > { %2068 = vpow2.f32 %v1064_v21 }
 0x3bb   : > { %v937_v28 = vpop.xlane.xlu0 %936  ;;  %v935_v42 = vpop.xlane.xlu2 %934 }
 0x3bc   : > { %v1016_v45 = vsub.f32 %v2671_v51, %v935_v42  ;;  %v1017_v39 = vsub.f32 %v2674_v38, %v937_v28  ;;  %v839_v37 = vpop.f32.mrf.mxu2  ;;  %v2880_v42 = vadd.f32 %v2426_v16, %v837_v31 }
 0x3bd   : > { %v2876_v35 = vadd.f32 %v2426_v16, %v839_v37 }
 0x3be   : > { %v1126_v50 = vmul.f32 1.442695, %v1016_v45  ;;  %v2065_v23 = vpop.eup %2064  ;;  %v1128_v54 = vmul.f32 1.442695, %v1017_v39 }
 0x3bf   : > { %v1312_v51 = vpack.c.bf16 %v2065_v23, %v2857_v49  ;;  %v2871_v44 = vpop.eup %2066 }
 0x3c0   : > { %904 = vmax.xlane.f32.xlu0 %v2865_v46  ;;  %902 = vmax.xlane.f32.xlu2 %v2861_v57  ;;  %2070 = vpow2.f32 %v1126_v50  ;;  %v2873_v45 = vpop.eup %2068  ;;  %v2883_v50 = vpop.f32.mrf.mxu1 }
 0x3c1   : > { %1441 = vmatmul.bf16.gmra.mxu3 %v1312_v51  ;;  %2072 = vpow2.f32 %v1128_v54  ;;  %3398 = vst [vmem:[#allocation14_spill] sm:$0xff] %v2883_v50  ;;  %v1297_v39 = vpack.c.bf16 %v2873_v45, %v2871_v44 }
 0x3c3   : > { %v877_v47 = vpop.xlane.xlu0 %876  ;;  %v875_v33 = vpop.xlane.xlu2 %874 }
 0x3c4   : > { %v987_v38 = vsub.f32 %v2684_v48, %v877_v47  ;;  %v986_v21 = vsub.f32 %v2680_v55, %v875_v33  ;;  %v2893_v55 = vadd.f32 %v2426_v16, %v2593_v58  ;;  %v2898_v33 = vadd.f32 %v2426_v16, %v2591_v56 }
 0x3c6   : > { %v2071_v28 = vpop.eup %2070  ;;  %v1068_v51 = vmul.f32 1.442695, %v987_v38  ;;  %v1066_v48 = vmul.f32 1.442695, %v986_v21 }
 0x3c7   : > { %1254 = vadd.xlane.f32.xlu1 %v2071_v28  ;;  %v2889_v31 = vpop.eup %2072 }
 0x3c8   : > { %968 = vmax.xlane.f32.xlu0 %v2876_v35  ;;  %966 = vmax.xlane.f32.xlu2 %v2880_v42  ;;  %2074 = vpow2.f32 %v1068_v51  ;;  %v1313_v21 = vpack.c.bf16 %v2889_v31, %v2071_v28  ;;  %v2917_v28 = vadd.f32 %v2426_v16, %v2595_v59 }
 0x3c9   : > { %1366 = vmatmul.bf16.gmra.mxu1 %v1297_v39  ;;  %2076 = vpow2.f32 %v1066_v48  ;;  %v2904_v39 = vpop.f32.mrf.mxu1 }
 0x3cb   : > { %v941_v37 = vpop.xlane.xlu0 %940  ;;  %v939_v47 = vpop.xlane.xlu2 %938 }
 0x3cc   : > { %v1019_v54 = vsub.f32 %v2692_v52, %v941_v37  ;;  %v1018_v38 = vsub.f32 %v2689_v60, %v939_v47  ;;  %v2912_v60 = vadd.f32 %v2426_v16, %v2597_v61 }
 0x3ce   : > { %v1132_v58 = vmul.f32 1.442695, %v1019_v54  ;;  %v1130_v51 = vmul.f32 1.442695, %v1018_v38  ;;  %v2906_v50 = vpop.eup %2074 }
 0x3cf   : > { %1252 = vadd.xlane.f32.xlu1 %v2065_v23  ;;  %v2908_v56 = vpop.eup %2076 }
 0x3d0   : > { %908 = vmax.xlane.f32.xlu0 %v2893_v55  ;;  %906 = vmax.xlane.f32.xlu2 %v2898_v33  ;;  %2078 = vpow2.f32 %v1132_v58  ;;  %v1298_v47 = vpack.c.bf16 %v2906_v50, %v2908_v56 }
 0x3d1   : > { %1446 = vmatmul.bf16.gmra.mxu3 %v1313_v21  ;;  %2080 = vpow2.f32 %v1130_v51  ;;  %v2927_v59 = vpop.f32.mrf.mxu1  ;;  %v2938_v51 = vadd.f32 %v2426_v16, %v2599_v63 }
 0x3d3   : > { %v881_v52 = vpop.xlane.xlu0 %880  ;;  %v879_v37 = vpop.xlane.xlu2 %878 }
 0x3d4   : > { %v989_v23 = vsub.f32 %v2702_v2, %v881_v52  ;;  %v988_v48 = vsub.f32 %v2698_v62, %v879_v37 }
 0x3d6   : > { %v1072_v61 = vmul.f32 1.442695, %v989_v23  ;;  %v1070_v54 = vmul.f32 1.442695, %v988_v48  ;;  %v2925_v21 = vpop.eup %2078 }
 0x3d7   : > { %1174 = vadd.xlane.f32.xlu1 %v2560_v34  ;;  %v2929_v58 = vpop.eup %2080  ;;  %v2933_v34 = vadd.f32 %v2426_v16, %v2601_v4 }
 0x3d8   : > { %912 = vmax.xlane.f32.xlu0 %v2912_v60  ;;  %910 = vmax.xlane.f32.xlu2 %v2917_v28  ;;  %2082 = vpow2.f32 %v1072_v61  ;;  %v1314_v37 = vpack.c.bf16 %v2925_v21, %v2929_v58 }
 0x3d9   : > { %1371 = vmatmul.bf16.gmra.mxu1 %v1298_v47  ;;  %2084 = vpow2.f32 %v1070_v54  ;;  %v2949_v16 = vpop.f32.mrf.mxu1 }
 0x3db   : > { %v945_v2 = vpop.xlane.xlu0 %944  ;;  %v943_v38 = vpop.xlane.xlu2 %942 }
 0x3dc   : > { %v1021_v62 = vsub.f32 %v2710_v8, %v945_v2  ;;  %v1020_v52 = vsub.f32 %v2707_v6, %v943_v38 }
 0x3de   : > { %v1136_v23 = vmul.f32 1.442695, %v1021_v62  ;;  %v1134_v4 = vmul.f32 1.442695, %v1020_v52  ;;  %v2945_v8 = vpop.eup %2082 }
 0x3df   : > { %v2947_v61 = vpop.eup %2084 }
 0x3e0   : > { %916 = vmax.xlane.f32.xlu0 %v2933_v34  ;;  %914 = vmax.xlane.f32.xlu2 %v2938_v51  ;;  %2086 = vpow2.f32 %v1136_v23  ;;  %v1299_v54 = vpack.c.bf16 %v2945_v8, %v2947_v61 }
 0x3e1   : > { %1451 = vmatmul.bf16.gmra.mxu3 %v1314_v37  ;;  %2088 = vpow2.f32 %v1134_v4 }
 0x3e3   : > { %v885_v48 = vpop.xlane.xlu0 %884  ;;  %v883_v47 = vpop.xlane.xlu2 %882 }
 0x3e4   : > { %v991_v63 = vsub.f32 %v2720_v15, %v885_v48  ;;  %v990_v6 = vsub.f32 %v2716_v13, %v883_v47 }
 0x3e6   : > { %v1076_v2 = vmul.f32 1.442695, %v991_v63  ;;  %v1074_v38 = vmul.f32 1.442695, %v990_v6  ;;  %v2957_v37 = vpop.eup %2086 }
 0x3e7   : > { %v2959_v23 = vpop.eup %2088 }
 0x3e8   : > { %1192 = vadd.xlane.f32.xlu0 %v2873_v45  ;;  %1190 = vadd.xlane.f32.xlu2 %v2871_v44  ;;  %2090 = vpow2.f32 %v1076_v2  ;;  %v2963_v45 = vpop.f32.mrf.mxu1  ;;  %v1315_v44 = vpack.c.bf16 %v2957_v37, %v2959_v23 }
 0x3e9   : > { %1376 = vmatmul.bf16.gmra.mxu1 %v1299_v54  ;;  %2092 = vpow2.f32 %v1074_v38 }
 0x3eb   : > { %v949_v62 = vpop.xlane.xlu0 %948  ;;  %v947_v52 = vpop.xlane.xlu2 %946 }
 0x3ec   : > { %v1023_v15 = vsub.f32 %v2728_v27, %v949_v62  ;;  %v1022_v13 = vsub.f32 %v2725_v22, %v947_v52 }
 0x3ee   : > { %v1140_v4 = vmul.f32 1.442695, %v1023_v15  ;;  %v1138_v48 = vmul.f32 1.442695, %v1022_v13  ;;  %v2969_v6 = vpop.eup %2090 }
 0x3ef   : > { %v2972_v54 = vpop.eup %2092 }
 0x3f0   : > { %1188 = vadd.xlane.f32.xlu0 %v2848_v20  ;;  %1186 = vadd.xlane.f32.xlu2 %v2840_v9  ;;  %2094 = vpow2.f32 %v1140_v4  ;;  %v1300_v9 = vpack.c.bf16 %v2969_v6, %v2972_v54  ;;  %v2979_v2 = vpop.f32.mrf.mxu1 }
 0x3f1   : > { %1456 = vmatmul.bf16.gmra.mxu3 %v1315_v44  ;;  %2096 = vpow2.f32 %v1138_v48 }
 0x3f3   : > { %v889_v47 = vpop.xlane.xlu0 %888  ;;  %v887_v63 = vpop.xlane.xlu2 %886 }
 0x3f4   : > { %v993_v27 = vsub.f32 %v2738_v30, %v889_v47  ;;  %v992_v20 = vsub.f32 %v2734_v25, %v887_v63 }
 0x3f6   : > { %v1080_v22 = vmul.f32 1.442695, %v993_v27  ;;  %v1078_v38 = vmul.f32 1.442695, %v992_v20  ;;  %v2981_v52 = vpop.eup %2094 }
 0x3f7   : > { %v2983_v15 = vpop.eup %2096 }
 0x3f8   : > { %2098 = vpow2.f32 %v1080_v22  ;;  %1184 = vadd.xlane.f32.xlu0 %v2814_v10  ;;  %1182 = vadd.xlane.f32.xlu2 %v2806_v0  ;;  %v1316_v0 = vpack.c.bf16 %v2981_v52, %v2983_v15  ;;  %v2991_v27 = vpop.f32.mrf.mxu1 }
 0x3f9   : > { %1381 = vmatmul.bf16.gmra.mxu1 %v1300_v9  ;;  %2100 = vpow2.f32 %v1078_v38 }
 0x3fb   : > { %v953_v30 = vpop.xlane.xlu0 %952  ;;  %v951_v62 = vpop.xlane.xlu2 %950 }
 0x3fc   : > { %v1025_v25 = vsub.f32 %v2748_v32, %v953_v30  ;;  %v1024_v10 = vsub.f32 %v2745_v12, %v951_v62 }
 0x3fe   : > { %v2099_v13 = vpop.eup %2098  ;;  %v1144_v44 = vmul.f32 1.442695, %v1025_v25  ;;  %v1142_v4 = vmul.f32 1.442695, %v1024_v10 }
 0x3ff   : > { %1208 = vadd.xlane.f32.xlu1 %v2099_v13  ;;  %v2101_v63 = vpop.eup %2100 }
 0x400   : > { %1180 = vadd.xlane.f32.xlu0 %v2780_v11  ;;  %1256 = vadd.xlane.f32.xlu2 %v2889_v31  ;;  %2102 = vpow2.f32 %v1144_v44  ;;  %v1301_v11 = vpack.c.bf16 %v2099_v13, %v2101_v63 }
 0x401   : > { %1461 = vmatmul.bf16.gmra.mxu3 %v1316_v0  ;;  %2104 = vpow2.f32 %v1142_v4 }
 0x403   : > { %v893_v48 = vpop.xlane.xlu0 %892  ;;  %v891_v47 = vpop.xlane.xlu2 %890 }
 0x404   : > { %v995_v32 = vsub.f32 %v2762_v1, %v893_v48  ;;  %v994_v12 = vsub.f32 %v2758_v41, %v891_v47  ;;  %v3003_v41 = vpop.f32.mrf.mxu1 }
 0x406   : > { %v1084_v31 = vmul.f32 1.442695, %v995_v32  ;;  %v1082_v22 = vmul.f32 1.442695, %v994_v12  ;;  %v2998_v38 = vpop.eup %2102 }
 0x407   : > { %1172 = vadd.xlane.f32.xlu1 %v2548_v26  ;;  %v3000_v30 = vpop.eup %2104 }
 0x408   : > { %1250 = vadd.xlane.f32.xlu0 %v2857_v49  ;;  %1178 = vadd.xlane.f32.xlu2 %v2772_v53  ;;  %2106 = vpow2.f32 %v1084_v31  ;;  %v1317_v53 = vpack.c.bf16 %v2998_v38, %v3000_v30 }
 0x409   : > { %1386 = vmatmul.bf16.gmra.mxu1 %v1301_v11  ;;  %2108 = vpow2.f32 %v1082_v22 }
 0x40b   : > { %v957_v20 = vpop.xlane.xlu0 %956  ;;  %v955_v9 = vpop.xlane.xlu2 %954 }
 0x40c   : > { %v1027_v1 = vsub.f32 %v2778_v17, %v957_v20  ;;  %v1026_v26 = vsub.f32 %v2775_v24, %v955_v9 }
 0x40e   : > { %v1148_v49 = vmul.f32 1.442695, %v1027_v1  ;;  %v1146_v62 = vmul.f32 1.442695, %v1026_v26  ;;  %v3010_v10 = vpop.eup %2106 }
 0x40f   : > { %1242 = vadd.xlane.f32.xlu1 %v2788_v7  ;;  %v2109_v17 = vpop.eup %2108 }
 0x410   : > { %1206 = vadd.xlane.f32.xlu0 %v2101_v63  ;;  %1176 = vadd.xlane.f32.xlu2 %v2564_v36  ;;  %2110 = vpow2.f32 %v1148_v49  ;;  %v1302_v36 = vpack.c.bf16 %v3010_v10, %v2109_v17  ;;  %v3401_v49 = vld [vmem:[#allocation12_spill] sm:$0xff] }
 0x411   : > { %1466 = vmatmul.bf16.gmra.mxu3 %v1317_v53  ;;  %2112 = vpow2.f32 %v1146_v62 }
 0x413   : > { %v897_v13 = vpop.xlane.xlu0 %896  ;;  %v895_v25 = vpop.xlane.xlu2 %894 }
 0x414   : > { %v3012_v0 = vpop.f32.mrf.mxu3  ;;  %v997_v24 = vsub.f32 %v2796_v5, %v897_v13  ;;  %v996_v7 = vsub.f32 %v2792_v19, %v895_v25  ;;  %v3402_v25 = vld [vmem:[#allocation11_spill] sm:$0xff] }
 0x416   : > { %v3016_v44 = vpop.f32.mrf.mxu1  ;;  %v1088_v4 = vmul.f32 1.442695, %v997_v24  ;;  %v1086_v48 = vmul.f32 1.442695, %v996_v7  ;;  %v2111_v32 = vpop.eup %2110 }
 0x417   : > { %1198 = vadd.xlane.f32.xlu1 %v2947_v61  ;;  %v3022_v5 = vpop.eup %2112 }
 0x418   : > { %1248 = vadd.xlane.f32.xlu0 %v2832_v40  ;;  %1246 = vadd.xlane.f32.xlu2 %v2822_v3  ;;  %2114 = vpow2.f32 %v1088_v4  ;;  %v3399_v3 = vld [vmem:[#allocation8_spill] sm:$0xff]  ;;  %v1318_v11 = vpack.c.bf16 %v2111_v32, %v3022_v5 }
 0x419   : > { %1391 = vmatmul.bf16.gmra.mxu1 %v1302_v36  ;;  %2116 = vpow2.f32 %v1086_v48 }
 0x41b   : > { %v961_v47 = vpop.xlane.xlu0 %960  ;;  %v959_v63 = vpop.xlane.xlu2 %958 }
 0x41c   : > { %v3024_v12 = vpop.f32.mrf.mxu3  ;;  %v1029_v19 = vsub.f32 %v2812_v43, %v961_v47  ;;  %v1028_v40 = vsub.f32 %v2809_v14, %v959_v63  ;;  %v3400_v14 = vld [vmem:[#allocation13_spill] sm:$0xff] }
 0x41e   : > { %v3028_v61 = vpop.f32.mrf.mxu1  ;;  %v1152_v31 = vmul.f32 1.442695, %v1029_v19  ;;  %v1150_v22 = vmul.f32 1.442695, %v1028_v40  ;;  %v2115_v1 = vpop.eup %2114  ;;  %v3403_v19 = vld [vmem:[#allocation7_spill] sm:$0xff] }
 0x41f   : > { %1210 = vadd.xlane.f32.xlu1 %v2109_v17  ;;  %v2117_v26 = vpop.eup %2116 }
 0x420   : > { %1170 = vadd.xlane.f32.xlu0 %v3399_v3  ;;  %1202 = vadd.xlane.f32.xlu2 %v2972_v54  ;;  %2118 = vpow2.f32 %v1152_v31  ;;  %v1303_v54 = vpack.c.bf16 %v2115_v1, %v2117_v26  ;;  %v3404_v3 = vld [vmem:[#allocation6_spill] sm:$0xff] }
 0x421   : > { %1471 = vmatmul.bf16.gmra.mxu3 %v1318_v11  ;;  %2120 = vpow2.f32 %v1150_v22 }
 0x423   : > { %v901_v20 = vpop.xlane.xlu0 %900  ;;  %v899_v9 = vpop.xlane.xlu2 %898 }
 0x424   : > { %v3033_v43 = vpop.f32.mrf.mxu3  ;;  %v999_v53 = vsub.f32 %v3400_v14, %v901_v20  ;;  %v998_v62 = vsub.f32 %v3401_v49, %v899_v9 }
 0x426   : > { %v3037_v13 = vpop.f32.mrf.mxu1  ;;  %v1092_v17 = vmul.f32 1.442695, %v999_v53  ;;  %v1090_v24 = vmul.f32 1.442695, %v998_v62  ;;  %v3041_v4 = vpop.eup %2118 }
 0x427   : > { %1276 = vadd.xlane.f32.xlu1 %v2111_v32  ;;  %v2121_v48 = vpop.eup %2120 }
 0x428   : > { %1204 = vadd.xlane.f32.xlu0 %v2969_v6  ;;  %1244 = vadd.xlane.f32.xlu2 %v3402_v25  ;;  %2122 = vpow2.f32 %v1092_v17  ;;  %v1319_v40 = vpack.c.bf16 %v3041_v4, %v2121_v48 }
 0x429   : > { %1396 = vmatmul.bf16.gmra.mxu1 %v1303_v54  ;;  %2124 = vpow2.f32 %v1090_v24 }
 0x42b   : > { %v965_v7 = vpop.xlane.xlu0 %964  ;;  %v963_v36 = vpop.xlane.xlu2 %962 }
 0x42c   : > { %v3043_v47 = vpop.f32.mrf.mxu3  ;;  %v1031_v63 = vsub.f32 %v2846_v29, %v965_v7  ;;  %v1030_v32 = vsub.f32 %v2843_v18, %v963_v36 }
 0x42e   : > { %v3047_v6 = vpop.f32.mrf.mxu1  ;;  %v1156_v11 = vmul.f32 1.442695, %v1031_v63  ;;  %v1154_v31 = vmul.f32 1.442695, %v1030_v32  ;;  %v2123_v9 = vpop.eup %2122 }
 0x42f   : > { %1278 = vadd.xlane.f32.xlu1 %v2121_v48  ;;  %v2125_v14 = vpop.eup %2124 }
 0x430   : > { %1168 = vadd.xlane.f32.xlu0 %v3403_v19  ;;  %1166 = vadd.xlane.f32.xlu2 %v3404_v3  ;;  %2126 = vpow2.f32 %v1156_v11  ;;  %v1304_v62 = vpack.c.bf16 %v2123_v9, %v2125_v14 }
 0x431   : > { %1476 = vmatmul.bf16.gmra.mxu3 %v1319_v40  ;;  %2128 = vpow2.f32 %v1154_v31 }
 0x433   : > { %v905_v22 = vpop.xlane.xlu0 %904  ;;  %v903_v20 = vpop.xlane.xlu2 %902 }
 0x434   : > { %v3052_v29 = vpop.f32.mrf.mxu3  ;;  %v1001_v18 = vsub.f32 %v2865_v46, %v905_v22  ;;  %v1000_v53 = vsub.f32 %v2861_v57, %v903_v20 }
 0x436   : > { %v3056_v49 = vpop.f32.mrf.mxu1  ;;  %v1096_v54 = vmul.f32 1.442695, %v1001_v18  ;;  %v1094_v25 = vmul.f32 1.442695, %v1000_v53  ;;  %v2127_v7 = vpop.eup %2126 }
 0x437   : > { %v3060_v63 = vpop.eup %2128 }
 0x438   : > { %1216 = vadd.xlane.f32.xlu0 %v2115_v1  ;;  %1212 = vadd.xlane.f32.xlu2 %v3010_v10  ;;  %2130 = vpow2.f32 %v1096_v54  ;;  %v1320_v10 = vpack.c.bf16 %v2127_v7, %v3060_v63 }
 0x439   : > { %1401 = vmatmul.bf16.gmra.mxu1 %v1304_v62  ;;  %2132 = vpow2.f32 %v1094_v25 }
 0x43a   : > { %v1255_v17 = vpop.xlane.xlu1 %1254 }
 0x43b   : > { %v969_v24 = vpop.xlane.xlu0 %968  ;;  %v967_v48 = vpop.xlane.xlu2 %966 }
 0x43c   : > { %v1033_v36 = vsub.f32 %v2876_v35, %v969_v24  ;;  %v3062_v46 = vpop.f32.mrf.mxu3  ;;  %v1032_v1 = vsub.f32 %v2880_v42, %v967_v48 }
 0x43e   : > { %v1160_v57 = vmul.f32 1.442695, %v1033_v36  ;;  %v3065_v32 = vpop.f32.mrf.mxu1  ;;  %v1158_v19 = vmul.f32 1.442695, %v1032_v1  ;;  %v2131_v40 = vpop.eup %2130 }
 0x43f   : > { %v2133_v31 = vpop.eup %2132 }
 0x440   : > { %2134 = vpow2.f32 %v1160_v57  ;;  %1274 = vadd.xlane.f32.xlu0 %v3022_v5  ;;  %1214 = vadd.xlane.f32.xlu2 %v2117_v26  ;;  %v1305_v26 = vpack.c.bf16 %v2131_v40, %v2133_v31 }
 0x441   : > { %1481 = vmatmul.bf16.gmra.mxu3 %v1320_v10  ;;  %2136 = vpow2.f32 %v1158_v19 }
 0x442   : > { %v1253_v3 = vpop.xlane.xlu1 %1252 }
 0x443   : > { %v909_v35 = vpop.xlane.xlu0 %908  ;;  %v907_v11 = vpop.xlane.xlu2 %906  ;;  %2138 = vrcp.f32 %v1253_v3 }
 0x444   : > { %v3069_v22 = vpop.f32.mrf.mxu3  ;;  %v1003_v42 = vsub.f32 %v2893_v55, %v909_v35  ;;  %v1002_v18 = vsub.f32 %v2898_v33, %v907_v11  ;;  %2140 = vrcp.f32 %v1255_v17  ;;  %v3405_v33 = vld [vmem:[#allocation4_spill] sm:$0xff] }
 0x446   : > { %v2135_v20 = vpop.eup %2134  ;;  %v1367_v5 = vpop.f32.mrf.mxu1  ;;  %v1100_v53 = vmul.f32 1.442695, %v1003_v42  ;;  %v1098_v62 = vmul.f32 1.442695, %v1002_v18 }
 0x447   : > { %1288 = vadd.xlane.f32.xlu1 %v2135_v20  ;;  %v2137_v25 = vpop.eup %2136 }
 0x448   : > { %1220 = vadd.xlane.f32.xlu0 %v2123_v9  ;;  %1218 = vadd.xlane.f32.xlu2 %v2125_v14  ;;  %2142 = vpow2.f32 %v1100_v53  ;;  %v1321_v9 = vpack.c.bf16 %v2135_v20, %v2137_v25 }
 0x449   : > { %1406 = vmatmul.bf16.gmra.mxu1 %v1305_v26  ;;  %v2139_v36 = vpop.eup %2138  ;;  %2144 = vpow2.f32 %v1098_v62 }
 0x44a   : > { %v2141_v14 = vpop.eup %2140 }
 0x44b   : > { %v913_v54 = vpop.xlane.xlu0 %912  ;;  %v911_v24 = vpop.xlane.xlu2 %910 }
 0x44c   : > { %v1444_v48 = vpop.f32.mrf.mxu3  ;;  %v1005_v3 = vsub.f32 %v2912_v60, %v913_v54  ;;  %v1004_v42 = vsub.f32 %v2917_v28, %v911_v24 }
 0x44d   : > { %v3073_v57 = vmul.f32 %v2139_v36, %v1444_v48 }
 0x44e   : > { %v1369_v55 = vpop.f32.mrf.mxu1  ;;  %v3076_v10 = vpop.eup %2142  ;;  %v1102_v20 = vmul.f32 1.442695, %v1004_v42 }
 0x44f   : > { %1162 = vadd.xlane.f32.xlu1 %v3405_v33  ;;  %v3078_v35 = vpop.eup %2144 }
 0x450   : > { %1224 = vadd.xlane.f32.xlu0 %v2131_v40  ;;  %1222 = vadd.xlane.f32.xlu2 %v2133_v31  ;;  %v1306_v40 = vpack.c.bf16 %v3076_v10, %v3078_v35  ;;  %v1104_v31 = vmul.f32 1.442695, %v1005_v3  ;;  %v1175_v3 = vpop.xlane.xlu1 %1174 }
 0x451   : > { %1486 = vmatmul.bf16.gmra.mxu3 %v1321_v9 }
 0x453   : > { %v917_v1 = vpop.xlane.xlu0 %916  ;;  %v915_v19 = vpop.xlane.xlu2 %914 }
 0x454   : > { %v1447_v17 = vpop.f32.mrf.mxu3  ;;  %v1007_v9 = vsub.f32 %v2933_v34, %v917_v1 }
 0x455   : > { %v3081_v11 = vmul.f32 %v2141_v14, %v1447_v17 }
 0x456   : > { %v3084_v18 = vpop.f32.mrf.mxu1  ;;  %v1108_v42 = vmul.f32 1.442695, %v1007_v9 }
 0x457   : > { %1196 = vadd.xlane.f32.xlu1 %v2906_v50 }
 0x458   : > { %1284 = vadd.xlane.f32.xlu0 %v2127_v7  ;;  %1200 = vadd.xlane.f32.xlu2 %v2945_v8 }
 0x459   : > { %1411 = vmatmul.bf16.gmra.mxu1 %v1306_v40 }
 0x45b   : > { %v1193_v26 = vpop.xlane.xlu0 %1192  ;;  %v1191_v60 = vpop.xlane.xlu2 %1190 }
 0x45c   : > { %2146 = vrcp.f32 %v1193_v26  ;;  %v3090_v53 = vpop.f32.mrf.mxu3 }
 0x45d   : > { %2148 = vrcp.f32 %v1191_v60 }
 0x45e   : > { %2150 = vpow2.f32 %v1104_v31  ;;  %v3092_v28 = vpop.f32.mrf.mxu1 }
 0x45f   : > { %2152 = vpow2.f32 %v1102_v20  ;;  %1266 = vadd.xlane.f32.xlu1 %v2983_v15  ;;  %v1006_v15 = vsub.f32 %v2938_v51, %v915_v19 }
 0x460   : > { %1286 = vadd.xlane.f32.xlu0 %v2137_v25  ;;  %1280 = vadd.xlane.f32.xlu2 %v3041_v4  ;;  %v3406_v4 = vld [vmem:[#allocation10_spill] sm:$0xff] }
 0x461   : > { %v1106_v1 = vmul.f32 1.442695, %v1006_v15  ;;  %v3407_v15 = vld [vmem:[#allocation5_spill] sm:$0xff] }
 0x462   : > { %v2147_v50 = vpop.eup %2146 }
 0x463   : > { %v2149_v8 = vpop.eup %2148  ;;  %v1189_v7 = vpop.xlane.xlu0 %1188  ;;  %v1571_v62 = vmul.f32 %v2147_v50, %v1369_v55 }
 0x464   : > { %v2151_v54 = vpop.eup %2150  ;;  %2154 = vrcp.f32 %v1189_v7  ;;  %v1187_v24 = vpop.xlane.xlu2 %1186  ;;  %v1570_v36 = vmul.f32 %v2149_v8, %v1367_v5 }
 0x465   : > { %v3096_v48 = vpop.eup %2152  ;;  %2156 = vrcp.f32 %v1187_v24  ;;  %v3098_v33 = vpop.f32.mrf.mxu3 }
 0x466   : > { %v1629_v14 = vpack.c.bf16 %v1571_v62, %v1570_v36  ;;  %v3102_v25 = vpop.f32.mrf.mxu1  ;;  %v1307_v5 = vpack.c.bf16 %v2151_v54, %v3096_v48 }
 0x467   : > { %1240 = vadd.xlane.f32.xlu1 %v3406_v4 }
 0x468   : > { %1272 = vadd.xlane.f32.xlu0 %v2998_v38  ;;  %v1696_v55 = vsel %vm572_vm2, %v1629_v14, 0  ;;  %1282 = vadd.xlane.f32.xlu2 %v3060_v63 }
 0x469   : > { %1770 = vmatpush.bf16.xpose.msra.mxu2 %v1696_v55  ;;  %1416 = vmatmul.bf16.gmra.mxu1 %v1307_v5 }
 0x46a   : > { %v2155_v17 = vpop.eup %2154 }
 0x46b   : > { %v2157_v34 = vpop.eup %2156  ;;  %v1185_v51 = vpop.xlane.xlu0 %1184  ;;  %v1569_v19 = vmul.f32 %v2155_v17, %v3065_v32 }
 0x46c   : > { %2158 = vrcp.f32 %v1185_v51  ;;  %v1183_v40 = vpop.xlane.xlu2 %1182  ;;  %v1568_v38 = vmul.f32 %v2157_v34, %v3056_v49  ;;  %v3408_v34 = vld [vmem:[#allocation9_spill] sm:$0xff] }
 0x46d   : > { %2160 = vrcp.f32 %v1183_v40  ;;  %v3111_v31 = vpop.f32.mrf.mxu3 }
 0x46e   : > { %2162 = vpow2.f32 %v1108_v42  ;;  %v1628_v20 = vpack.c.bf16 %v1569_v19, %v1568_v38  ;;  %v3113_v63 = vpop.f32.mrf.mxu1 }
 0x46f   : > { %2164 = vpow2.f32 %v1106_v1  ;;  %1232 = vadd.xlane.f32.xlu1 %v2151_v54 }
 0x470   : > { %1194 = vadd.xlane.f32.xlu0 %v2908_v56  ;;  %v1693_v26 = vsel %vm572_vm2, %v1628_v20, 0  ;;  %1270 = vadd.xlane.f32.xlu2 %v3000_v30 }
 0x471   : > { %1771 = vmatpush.bf16.xpose.msra.mxu2 %v1693_v26 }
 0x472   : > { %v2159_v32 = vpop.eup %2158  ;;  %v1209_v60 = vpop.xlane.xlu1 %1208 }
 0x473   : > { %v2161_v50 = vpop.eup %2160  ;;  %v1181_v49 = vpop.xlane.xlu0 %1180  ;;  %v1567_v8 = vmul.f32 %v2159_v32, %v3047_v6 }
 0x474   : > { %v2163_v7 = vpop.eup %2162  ;;  %v1257_v62 = vpop.xlane.xlu2 %1256  ;;  %v1566_v24 = vmul.f32 %v2161_v50, %v3037_v13 }
 0x475   : > { %v2165_v36 = vpop.eup %2164  ;;  %2166 = vrcp.f32 %v1257_v62  ;;  %v3120_v54 = vpop.f32.mrf.mxu3 }
 0x476   : > { %v1627_v56 = vpack.c.bf16 %v1567_v8, %v1566_v24  ;;  %v3122_v9 = vpop.f32.mrf.mxu1  ;;  %v1308_v14 = vpack.c.bf16 %v2163_v7, %v2165_v36  ;;  %2168 = vrcp.f32 %v1181_v49 }
 0x477   : > { %1226 = vadd.xlane.f32.xlu1 %v3078_v35 }
 0x478   : > { %1236 = vadd.xlane.f32.xlu0 %v2163_v7  ;;  %v1690_v30 = vsel %vm572_vm2, %v1627_v56, 0  ;;  %1164 = vadd.xlane.f32.xlu2 %v3407_v15 }
 0x479   : > { %1772 = vmatpush.bf16.xpose.msra.mxu2 %v1690_v30  ;;  %1421 = vmatmul.bf16.gmra.mxu1 %v1308_v14 }
 0x47a   : > { %v1173_v4 = vpop.xlane.xlu1 %1172 }
 0x47b   : > { %v2167_v6 = vpop.eup %2166  ;;  %v1251_v13 = vpop.xlane.xlu0 %1250 }
 0x47c   : > { %2170 = vrcp.f32 %v1251_v13  ;;  %v1179_v55 = vpop.xlane.xlu2 %1178  ;;  %v3128_v5 = vmul.f32 %v2167_v6, %v3090_v53  ;;  %v2169_v1 = vpop.eup %2168 }
 0x47d   : > { %2172 = vrcp.f32 %v1179_v55  ;;  %v3130_v17 = vpop.f32.mrf.mxu3  ;;  %v1565_v26 = vmul.f32 %v2169_v1, %v3028_v61 }
 0x47e   : > { %v1645_v35 = vpack.c.bf16 %v3128_v5, %v3081_v11  ;;  %v3134_v42 = vpop.f32.mrf.mxu1  ;;  %2174 = vrcp.f32 %v1175_v3 }
 0x47f   : > { %1260 = vadd.xlane.f32.xlu1 %v2925_v21 }
 0x480   : > { %1238 = vadd.xlane.f32.xlu0 %v3408_v34  ;;  %1268 = vadd.xlane.f32.xlu2 %v2981_v52 }
 0x482   : > { %v2171_v51 = vpop.eup %2170  ;;  %v1243_v52 = vpop.xlane.xlu1 %1242 }
 0x483   : > { %v2173_v19 = vpop.eup %2172  ;;  %v1207_v53 = vpop.xlane.xlu0 %1206  ;;  %v3140_v40 = vmul.f32 %v2171_v51, %v3069_v22 }
 0x484   : > { %2176 = vrcp.f32 %v1207_v53  ;;  %v1177_v38 = vpop.xlane.xlu2 %1176  ;;  %v1564_v20 = vmul.f32 %v2173_v19, %v3016_v44  ;;  %v2175_v3 = vpop.eup %2174 }
 0x485   : > { %2178 = vrcp.f32 %v1177_v38  ;;  %v3144_v21 = vpop.f32.mrf.mxu3  ;;  %v1644_v32 = vpack.c.bf16 %v3073_v57, %v3140_v40  ;;  %v1562_v24 = vmul.f32 %v2175_v3, %v2991_v27 }
 0x486   : > { %v1626_v50 = vpack.c.bf16 %v1565_v26, %v1564_v20  ;;  %v1387_v49 = vpop.f32.mrf.mxu1  ;;  %2180 = vrcp.f32 %v1209_v60 }
 0x488   : > { %1230 = vadd.xlane.f32.xlu0 %v3096_v48  ;;  %v1687_v22 = vsel %vm572_vm2, %v1626_v50, 0  ;;  %1234 = vadd.xlane.f32.xlu2 %v2165_v36 }
 0x489   : > { %1773 = vmatpush.bf16.xpose.msra.mxu2 %v1687_v22 }
 0x48a   : > { %v2177_v44 = vpop.eup %2176  ;;  %v3156_v60 = vpop.xlane.xlu1 %1198 }
 0x48b   : > { %v2179_v8 = vpop.eup %2178  ;;  %v3150_v61 = vmul.f32 %v2177_v44, %v1387_v49  ;;  %v1249_v7 = vpop.xlane.xlu0 %1248 }
 0x48c   : > { %2182 = vrcp.f32 %v1249_v7  ;;  %v1247_v62 = vpop.xlane.xlu2 %1246  ;;  %v1563_v56 = vmul.f32 %v2179_v8, %v3003_v41  ;;  %v2181_v14 = vpop.eup %2180 }
 0x48d   : > { %2184 = vrcp.f32 %v1247_v62  ;;  %v3154_v30 = vpop.f32.mrf.mxu3 }
 0x48e   : > { %v1625_v48 = vpack.c.bf16 %v1563_v56, %v1562_v24  ;;  %v1389_v15 = vpop.f32.mrf.mxu1  ;;  %2186 = vrcp.f32 %v1173_v4 }
 0x48f   : > { %v3158_v36 = vmul.f32 %v2181_v14, %v1389_v15  ;;  %v1655_v15 = vld [vmem:[%s3375_s6 + $0x8] sm:$0xff] }
 0x490   : > { %1264 = vadd.xlane.f32.xlu0 %v2957_v37  ;;  %v1684_v6 = vsel %vm572_vm2, %v1625_v48, 0  ;;  %1262 = vadd.xlane.f32.xlu2 %v2959_v23 }
 0x491   : > { %1774 = vmatpush.bf16.xpose.msra.mxu2 %v1684_v6  ;;  %v1633_v41 = vpack.c.bf16 %v3158_v36, %v3150_v61  ;;  %v1744_v61 = vsel %vm572_vm2, %v1645_v35, 0 }
 0x492   : > { %v2183_v27 = vpop.eup %2182 }
 0x493   : > { %v2185_v13 = vpop.eup %2184  ;;  %v1171_v55 = vpop.xlane.xlu0 %1170  ;;  %v3166_v34 = vmul.f32 %v2183_v27, %v3062_v46 }
 0x494   : > { %2188 = vrcp.f32 %v1171_v55  ;;  %v1203_v1 = vpop.xlane.xlu2 %1202  ;;  %v3169_v51 = vmul.f32 %v2185_v13, %v3052_v29  ;;  %v2187_v19 = vpop.eup %2186 }
 0x495   : > { %2190 = vrcp.f32 %v1203_v1  ;;  %v3171_v37 = vpop.f32.mrf.mxu3  ;;  %v1211_v46 = vpop.xlane.xlu1 %1210  ;;  %v1561_v26 = vmul.f32 %v2187_v19, %v2979_v2 }
 0x496   : > { %v1643_v23 = vpack.c.bf16 %v3166_v34, %v3169_v51  ;;  %v1392_v4 = vpop.f32.mrf.mxu1  ;;  %2192 = vrcp.f32 %v1243_v52 }
 0x498   : > { %1258 = vadd.xlane.f32.xlu0 %v2929_v58  ;;  %1228 = vadd.xlane.f32.xlu2 %v3076_v10 }
 0x49a   : > { %v2189_v53 = vpop.eup %2188 }
 0x49b   : > { %v2191_v38 = vpop.eup %2190  ;;  %v1205_v20 = vpop.xlane.xlu0 %1204  ;;  %v1560_v29 = vmul.f32 %v2189_v53, %v2963_v45 }
 0x49c   : > { %2194 = vrcp.f32 %v1205_v20  ;;  %v1245_v50 = vpop.xlane.xlu2 %1244  ;;  %v3180_v49 = vmul.f32 %v2191_v38, %v3122_v9  ;;  %v2193_v44 = vpop.eup %2192  ;;  %v1654_v38 = vld [vmem:[%s3375_s6] sm:$0xff] }
 0x49d   : > { %2196 = vrcp.f32 %v1245_v50  ;;  %v3182_v22 = vpop.f32.mrf.mxu3  ;;  %v1624_v58 = vpack.c.bf16 %v1561_v26, %v1560_v29  ;;  %v1277_v2 = vpop.xlane.xlu1 %1276  ;;  %v3189_v9 = vmul.f32 %v2193_v44, %v3033_v43 }
 0x49e   : > { %v1394_v3 = vpop.f32.mrf.mxu1 }
 0x49f   : > { %v1681_v10 = vsel %vm572_vm2, %v1624_v58, 0 }
 0x4a0   : > { %1775 = vmatpush.bf16.xpose.msra.mxu2 %v1681_v10 }
 0x4a2   : > { %v2195_v52 = vpop.eup %2194 }
 0x4a3   : > { %v2197_v8 = vpop.eup %2196  ;;  %v1169_v7 = vpop.xlane.xlu0 %1168  ;;  %v3186_v45 = vmul.f32 %v2195_v52, %v3134_v42 }
 0x4a4   : > { %2198 = vrcp.f32 %v1169_v7  ;;  %v1167_v62 = vpop.xlane.xlu2 %1166  ;;  %v3192_v24 = vmul.f32 %v2197_v8, %v3043_v47 }
 0x4a5   : > { %2200 = vrcp.f32 %v1167_v62  ;;  %v1472_v56 = vpop.f32.mrf.mxu3  ;;  %v1632_v48 = vpack.c.bf16 %v3186_v45, %v3180_v49 }
 0x4a6   : > { %v1642_v14 = vpack.c.bf16 %v3192_v24, %v3189_v9  ;;  %2202 = vrcp.f32 %v1277_v2  ;;  %v3198_v42 = vpop.f32.mrf.mxu1 }
 0x4a7   : > { %2204 = vrcp.f32 %v1211_v46 }
 0x4aa   : > { %v2199_v43 = vpop.eup %2198 }
 0x4ab   : > { %v2201_v6 = vpop.eup %2200  ;;  %v1217_v47 = vpop.xlane.xlu0 %1216  ;;  %v1559_v27 = vmul.f32 %v2199_v43, %v2949_v16 }
 0x4ac   : > { %v1213_v13 = vpop.xlane.xlu2 %1212  ;;  %1663 = vperm.xlu0 %2019, %v1655_v15   ;;  %v1558_v55 = vmul.f32 %v2201_v6, %v2927_v59  ;;  %v2203_v1 = vpop.eup %2202 }
 0x4ad   : > { %2206 = vrcp.f32 %v1213_v13  ;;  %v1474_v19 = vpop.f32.mrf.mxu3  ;;  %v2205_v26 = vpop.eup %2204 }
 0x4ae   : > { %v3205_v53 = vmul.f32 %v2203_v1, %v1474_v19  ;;  %v1623_v20 = vpack.c.bf16 %v1559_v27, %v1558_v55  ;;  %v1399_v29 = vpop.f32.mrf.mxu1  ;;  %v1580_v58 = vmul.f32 %v2205_v26, %v1392_v4 }
 0x4b0   : > { %v1678_v46 = vsel %vm572_vm2, %v1623_v20, 0  ;;  %1658 = vperm.xlu2 %2020, %v1654_v38  }
 0x4b1   : > { %1776 = vmatpush.bf16.xpose.msra.mxu2 %v1678_v46 }
 0x4b3   : > { %v2207_v16 = vpop.eup %2206  ;;  %v1275_v50 = vpop.xlane.xlu0 %1274 }
 0x4b4   : > { %2208 = vrcp.f32 %v1275_v50  ;;  %v1215_v59 = vpop.xlane.xlu2 %1214  ;;  %v1581_v10 = vmul.f32 %v2207_v16, %v1394_v3 }
 0x4b6   : > { %v1634_v44 = vpack.c.bf16 %v1581_v10, %v1580_v58  ;;  %v1402_v52 = vpop.f32.mrf.mxu1 }
 0x4ba   : > { %v2209_v8 = vpop.eup %2208 }
 0x4bb   : > { %v3211_v7 = vmul.f32 %v2209_v8, %v1472_v56  ;;  %v1221_v2 = vpop.xlane.xlu0 %1220  ;;  %v3215_v56 = vpop.f32.mrf.mxu3 }
 0x4bc   : > { %v1219_v62 = vpop.xlane.xlu2 %1218 }
 0x4bd   : > { %v1650_v15 = vpack.c.bf16 %v3205_v53, %v3211_v7 }
 0x4be   : > { %v1404_v43 = vpop.f32.mrf.mxu1 }
 0x4c3   : > { %v1225_v27 = vpop.xlane.xlu0 %1224 }
 0x4c4   : > { %v1223_v6 = vpop.xlane.xlu2 %1222 }
 0x4c5   : > { %2210 = vrcp.f32 %v1223_v6 }
 0x4c6   : > { %v1407_v13 = vpop.f32.mrf.mxu1  ;;  %2212 = vrcp.f32 %v1225_v27  ;;  %v3224_v27 = vpop.f32.mrf.mxu3 }
 0x4c7   : > { %2214 = vrcp.f32 %v1221_v2  ;;  %v3222_v2 = vpop.xlane.xlu1 %1278 }
 0x4c8   : > { %2216 = vrcp.f32 %v1219_v62 }
 0x4c9   : > { %2218 = vrcp.f32 %v1215_v59 }
 0x4ca   : > { %2220 = vrcp.f32 %v1217_v47 }
 0x4cb   : > { %v2211_v3 = vpop.eup %2210  ;;  %v3217_v16 = vpop.xlane.xlu0 %1284 }
 0x4cc   : > { %v1201_v4 = vpop.xlane.xlu2 %1200  ;;  %v2213_v55 = vpop.eup %2212  ;;  %v1586_v38 = vmul.f32 %v2211_v3, %v1407_v13 }
 0x4cd   : > { %v2215_v19 = vpop.eup %2214 }
 0x4ce   : > { %v1409_v1 = vpop.f32.mrf.mxu1  ;;  %v2217_v46 = vpop.eup %2216  ;;  %v1585_v58 = vmul.f32 %v2215_v19, %v1404_v43 }
 0x4cf   : > { %v1587_v20 = vmul.f32 %v2213_v55, %v1409_v1  ;;  %v1584_v50 = vmul.f32 %v2217_v46, %v1402_v52  ;;  %v2219_v6 = vpop.eup %2218  ;;  %v1289_v1 = vpop.xlane.xlu1 %1288 }
 0x4d0   : > { %v2221_v13 = vpop.eup %2220  ;;  %v1582_v55 = vmul.f32 %v2219_v6, %v3198_v42  ;;  %v1711_v42 = vsel %vm572_vm2, %v1634_v44, 0 }
 0x4d1   : > { %v1637_v26 = vpack.c.bf16 %v1587_v20, %v1586_v38  ;;  %v1636_v62 = vpack.c.bf16 %v1585_v58, %v1584_v50  ;;  %v1583_v43 = vmul.f32 %v2221_v13, %v1399_v29  ;;  %v3228_v38 = vpop.f32.mrf.mxu3 }
 0x4d3   : > { %v1720_v8 = vsel %vm572_vm2, %v1637_v26, 0  ;;  %v1717_v59 = vsel %vm572_vm2, %v1636_v62, 0  ;;  %v1287_v52 = vpop.xlane.xlu0 %1286  ;;  %v1635_v19 = vpack.c.bf16 %v1583_v43, %v1582_v55  ;;  %v1708_v55 = vsel %vm572_vm2, %v1633_v41, 0  ;;  %v3409_v43 = vld [vmem:[#allocation14_spill] sm:$0xff] }
 0x4d4   : > { %v3219_v10 = vpop.xlane.xlu2 %1280  ;;  %1784 = vmatpush.bf16.xpose.msrb.mxu3 %v1720_v8 }
 0x4d5   : > { %v1714_v20 = vsel %vm572_vm2, %v1635_v19, 0 }
 0x4d6   : > { %v3233_v46 = vpop.f32.mrf.mxu1 }
 0x4d7   : > { %v1163_v50 = vpop.xlane.xlu1 %1162 }
 0x4d8   : > { %2222 = vrcp.f32 %v1163_v50 }
 0x4d9   : > { %v3238_v29 = vpop.f32.mrf.mxu3 }
 0x4db   : > { %v3235_v26 = vpop.xlane.xlu0 %1272 }
 0x4dc   : > { %v1283_v3 = vpop.xlane.xlu2 %1282  ;;  %1785 = vmatpush.bf16.xpose.msrb.mxu3 %v1717_v59 }
 0x4de   : > { %v3240_v8 = vpop.f32.mrf.mxu1  ;;  %v2223_v62 = vpop.eup %2222 }
 0x4df   : > { %v1197_v59 = vpop.xlane.xlu1 %1196  ;;  %v1556_v19 = vmul.f32 %v2223_v62, %v3409_v43 }
 0x4e1   : > { %v1487_v50 = vpop.f32.mrf.mxu3 }
 0x4e3   : > { %v1195_v6 = vpop.xlane.xlu0 %1194 }
 0x4e4   : > { %v3230_v47 = vpop.xlane.xlu2 %1270  ;;  %1786 = vmatpush.bf16.xpose.msrb.mxu3 %v1714_v20 }
 0x4e6   : > { %v3254_v36 = vpop.f32.mrf.mxu1 }
 0x4e7   : > { %v3266_v5 = vpop.xlane.xlu1 %1266 }
 0x4e9   : > { %v1489_v62 = vpop.f32.mrf.mxu3 }
 0x4ec   : > { %v1165_v58 = vpop.xlane.xlu2 %1164  ;;  %1787 = vmatpush.bf16.xpose.msrb.mxu3 %v1711_v42 }
 0x4ed   : > { %2224 = vrcp.f32 %v1165_v58 }
 0x4ee   : > { %2226 = vrcp.f32 %v1201_v4  ;;  %v3263_v4 = vld [vmem:[%s3374_s5] sm:$0xff] }
 0x4ef   : > { %2228 = vrcp.f32 %v3156_v60  ;;  %v1705_v60 = vsel %vm572_vm2, %v1632_v48, 0  ;;  %v1741_v48 = vsel %vm572_vm2, %v1644_v32, 0  ;;  %v1241_v32 = vpop.xlane.xlu1 %1240 }
 0x4f0   : > { %2230 = vrcp.f32 %v1195_v6 }
 0x4f1   : > { %2232 = vrcp.f32 %v1289_v1 }
 0x4f2   : > { %2234 = vrcp.f32 %v1197_v59 }
 0x4f3   : > { %v2225_v13 = vpop.eup %2224  ;;  %2236 = vrcp.f32 %v1287_v52  ;;  %v3277_v52 = vpop.f32.mrf.mxu1 }
 0x4f4   : > { %v1557_v44 = vmul.f32 %v2225_v13, %v2904_v39  ;;  %1788 = vmatpush.bf16.xpose.msrb.mxu3 %v1708_v55  ;;  %v2227_v42 = vpop.eup %2226  ;;  %v1237_v39 = vpop.xlane.xlu0 %1236  ;;  %2238 = vrcp.f32 %v1283_v3  ;;  %v1738_v3 = vsel %vm572_vm2, %v1643_v23, 0  ;;  %v1735_v23 = vsel %vm572_vm2, %v1642_v14, 0 }
 0x4f5   : > { %v2229_v41 = vpop.eup %2228  ;;  %v1575_v11 = vmul.f32 %v2227_v42, %v3113_v63  ;;  %v3269_v1 = vpop.xlane.xlu2 %1268  ;;  %2240 = vrcp.f32 %v3217_v16 }
 0x4f6   : > { %v1622_v20 = vpack.c.bf16 %v1557_v44, %v1556_v19  ;;  %v1574_v35 = vmul.f32 %v2229_v41, %v3102_v25  ;;  %v2231_v45 = vpop.eup %2230 }
 0x4f7   : > { %v2233_v63 = vpop.eup %2232  ;;  %v1572_v59 = vmul.f32 %v2231_v45, %v3084_v18 }
 0x4f8   : > { %v1675_v58 = vsel %vm572_vm2, %v1622_v20, 0  ;;  %v1631_v49 = vpack.c.bf16 %v1575_v11, %v1574_v35  ;;  %v2235_v6 = vpop.eup %2234  ;;  %v1619_v55 = vmul.f32 %v2233_v63, %v1489_v62 }
 0x4f9   : > { %1777 = vmatpush.bf16.xpose.msra.mxu2 %v1675_v58  ;;  %v2237_v13 = vpop.eup %2236  ;;  %v1573_v57 = vmul.f32 %v2235_v6, %v3092_v28 }
 0x4fa   : > { %v1702_v25 = vsel %vm572_vm2, %v1631_v49, 0  ;;  %v1618_v40 = vmul.f32 %v2237_v13, %v1487_v50  ;;  %v2239_v58 = vpop.eup %2238 }
 0x4fb   : > { %v1630_v19 = vpack.c.bf16 %v1573_v57, %v1572_v59  ;;  %v2241_v18 = vpop.eup %2240  ;;  %v1616_v50 = vmul.f32 %v2239_v58, %v3228_v38 }
 0x4fc   : > { %1789 = vmatpush.bf16.xpose.msrb.mxu3 %v1705_v60  ;;  %v1239_v43 = vpop.xlane.xlu0 %1238  ;;  %v1653_v44 = vpack.c.bf16 %v1619_v55, %v1618_v40  ;;  %v1617_v34 = vmul.f32 %v2241_v18, %v3238_v29  ;;  %v1233_v29 = vpop.xlane.xlu1 %1232 }
 0x4fd   : > { %2242 = vrcp.f32 %v1239_v43  ;;  %v1235_v20 = vpop.xlane.xlu2 %1234  ;;  %v1699_v16 = vsel %vm572_vm2, %v1630_v19, 0 }
 0x4fe   : > { %2244 = vrcp.f32 %v1241_v32  ;;  %v1768_v28 = vsel %vm572_vm2, %v1653_v44, 0 }
 0x4ff   : > { %2246 = vrcp.f32 %v3219_v10  ;;  %v1652_v10 = vpack.c.bf16 %v1617_v34, %v1616_v50 }
 0x500   : > { %1982 = vmatmul.msk.bf16.vlgmr.msra.gmra.mxu2 %vm572_vm2, %v3263_v4  ;;  %2248 = vrcp.f32 %v3222_v2 }
 0x501   : > { %1798 = vmatpush.bf16.xpose.msrb.mxu2 %v1744_v61  ;;  %v1422_v61 = vpop.f32.mrf.mxu1  ;;  %2250 = vrcp.f32 %v1235_v20  ;;  %v1765_v49 = vsel %vm572_vm2, %v1652_v10, 0 }
 0x502   : > { %2252 = vrcp.f32 %v1237_v39 }
 0x503   : > { %v2243_v42 = vpop.eup %2242 }
 0x504   : > { %1790 = vmatpush.bf16.xpose.msrb.mxu3 %v1702_v25  ;;  %v2245_v51 = vpop.eup %2244  ;;  %v1594_v41 = vmul.f32 %v2243_v42, %v3012_v0  ;;  %v1231_v35 = vpop.xlane.xlu0 %1230 }
 0x505   : > { %v2247_v60 = vpop.eup %2246  ;;  %v1263_v38 = vpop.xlane.xlu2 %1262  ;;  %v1595_v11 = vmul.f32 %v2245_v51, %v3024_v12  ;;  %2254 = vrcp.f32 %v1231_v35 }
 0x506   : > { %v2249_v2 = vpop.eup %2248  ;;  %v1615_v24 = vmul.f32 %v2247_v60, %v3224_v27  ;;  %2256 = vrcp.f32 %v1233_v29 }
 0x507   : > { %v1641_v9 = vpack.c.bf16 %v1595_v11, %v1594_v41  ;;  %v2251_v14 = vpop.eup %2250  ;;  %v1614_v0 = vmul.f32 %v2249_v2, %v3215_v56  ;;  %2258 = vrcp.f32 %v3230_v47  ;;  %v1227_v56 = vpop.xlane.xlu1 %1226 }
 0x508   : > { %v2253_v63 = vpop.eup %2252  ;;  %2260 = vrcp.f32 %v3235_v26  ;;  %v1759_v26 = vsel %vm572_vm2, %v1650_v15, 0 }
 0x509   : > { %1799 = vmatpush.bf16.xpose.msrb.mxu2 %v1741_v48  ;;  %v1424_v45 = vpop.f32.mrf.mxu1  ;;  %v1592_v48 = vmul.f32 %v2251_v14, %v1422_v61  ;;  %v1732_v12 = vsel %vm572_vm2, %v1641_v9, 0  ;;  %v1651_v39 = vpack.c.bf16 %v1615_v24, %v1614_v0  ;;  %v2280_v0 = vld [vmem:[%s2385_s14 + $0x8] sm:$0xff] }
 0x50a   : > { %v1593_v62 = vmul.f32 %v2253_v63, %v1424_v45 }
 0x50b   : > { %v1762_v27 = vsel %vm572_vm2, %v1651_v39, 0  ;;  %v2255_v25 = vpop.eup %2254  ;;  %v2281_v39 = vld [vmem:[%s2385_s14 + $0x28] sm:$0xff] }
 0x50c   : > { %1791 = vmatpush.bf16.xpose.msrb.mxu3 %v1699_v16  ;;  %v1640_v6 = vpack.c.bf16 %v1593_v62, %v1592_v48  ;;  %v2257_v59 = vpop.eup %2256  ;;  %v1590_v43 = vmul.f32 %v2255_v25, %v3254_v36  ;;  %v1265_v36 = vpop.xlane.xlu0 %1264 }
 0x50d   : > { %v1229_v13 = vpop.xlane.xlu2 %1228  ;;  %v2259_v57 = vpop.eup %2258  ;;  %v1591_v47 = vmul.f32 %v2257_v59, %v3277_v52  ;;  %v2283_v59 = vld [vmem:[%s2385_s14 + $0x30] sm:$0xff] }
 0x50e   : > { %2262 = vrcp.f32 %v1229_v13  ;;  %v1729_v55 = vsel %vm572_vm2, %v1640_v6, 0  ;;  %v2261_v40 = vpop.eup %2260  ;;  %v1610_v19 = vmul.f32 %v2259_v57, %v3171_v37  ;;  %v2282_v13 = vld [vmem:[%s2385_s14 + $0x10] sm:$0xff] }
 0x50f   : > { %2264 = vrcp.f32 %v1227_v56  ;;  %v1639_v32 = vpack.c.bf16 %v1591_v47, %v1590_v43  ;;  %v1611_v20 = vmul.f32 %v2261_v40, %v3182_v22  ;;  %v1261_v61 = vpop.xlane.xlu1 %1260  ;;  %v2284_v47 = vld [vmem:[%s2385_s14 + $0x18] sm:$0xff] }
 0x510   : > { %2266 = vrcp.f32 %v3269_v1 }
 0x511   : > { %1800 = vmatpush.bf16.xpose.msrb.mxu2 %v1738_v3  ;;  %2268 = vrcp.f32 %v3266_v5  ;;  %v1726_v52 = vsel %vm572_vm2, %v1639_v32, 0  ;;  %v1649_v58 = vpack.c.bf16 %v1611_v20, %v1610_v19  ;;  %v2285_v19 = vld [vmem:[%s2385_s14 + $0x38] sm:$0xff] }
 0x512   : > { %2270 = vrcp.f32 %v1265_v36 }
 0x513   : > { %1983 = vmatmul.msk.bf16.vlgmr.msrb.gmra.mxu3 %vm572_vm2, %v3263_v4  ;;  %2272 = vrcp.f32 %v1263_v38  ;;  %v1756_v37 = vsel %vm572_vm2, %v1649_v58, 0 }
 0x514   : > { %1812 = vmatpush.bf16.xpose.msra.mxu3 %v1768_v28  ;;  %v2263_v44 = vpop.eup %2262  ;;  %v1259_v28 = vpop.xlane.xlu0 %1258 }
 0x515   : > { %v2265_v3 = vpop.eup %2264  ;;  %v1589_v1 = vmul.f32 %v2263_v44, %v3240_v8  ;;  %2274 = vrcp.f32 %v1259_v28  ;;  %v1659_v38 = vpop.permute.xlu2 %1658 }
 0x516   : > { %v2267_v18 = vpop.eup %2266  ;;  %v1588_v53 = vmul.f32 %v2265_v3, %v3233_v46  ;;  %2276 = vrcp.f32 %v1261_v61 }
 0x517   : > { %v2269_v7 = vpop.eup %2268  ;;  %v1609_v5 = vmul.f32 %v2267_v18, %v3154_v30 }
 0x518   : > { %v1638_v15 = vpack.c.bf16 %v1589_v1, %v1588_v53  ;;  %v1608_v22 = vmul.f32 %v2269_v7, %v3144_v21  ;;  %v2271_v16 = vpop.eup %2270 }
 0x519   : > { %1801 = vmatpush.bf16.xpose.msrb.mxu2 %v1735_v23  ;;  %v2273_v42 = vpop.eup %2272  ;;  %v1607_v51 = vmul.f32 %v2271_v16, %v3130_v17 }
 0x51a   : > { %v1723_v50 = vsel %vm572_vm2, %v1638_v15, 0  ;;  %v1648_v8 = vpack.c.bf16 %v1609_v5, %v1608_v22  ;;  %v1606_v34 = vmul.f32 %v2273_v42, %v3120_v54 }
 0x51b   : > { %v2275_v30 = vpop.eup %2274 }
 0x51c   : > { %1813 = vmatpush.bf16.xpose.msra.mxu3 %v1765_v49  ;;  %v1753_v46 = vsel %vm572_vm2, %v1648_v8, 0  ;;  %v1647_v21 = vpack.c.bf16 %v1607_v51, %v1606_v34  ;;  %v2277_v23 = vpop.eup %2276  ;;  %v1604_v41 = vmul.f32 %v2275_v30, %v3098_v33  ;;  %v2278_v33 = vld [vmem:[%s2385_s14] sm:$0xff] }
 0x51d   : > { %v1605_v54 = vmul.f32 %v2277_v23, %v3111_v31  ;;  %v2279_v49 = vld [vmem:[%s2385_s14 + $0x20] sm:$0xff] }
 0x51e   : > { %v1750_v10 = vsel %vm572_vm2, %v1647_v21, 0  ;;  %v1664_v29 = vpop.permute.xlu0 %1663 }
 0x51f   : > { %v1646_v60 = vpack.c.bf16 %v1605_v54, %v1604_v41 }
 0x521   : > { %1802 = vmatpush.bf16.xpose.msrb.mxu2 %v1732_v12  ;;  %v1747_v17 = vsel %vm572_vm2, %v1646_v60, 0 }
 0x524   : > { %1814 = vmatpush.bf16.xpose.msra.mxu3 %v1762_v27 }
 0x529   : > { %1803 = vmatpush.bf16.xpose.msrb.mxu2 %v1729_v55 }
 0x52c   : > { %1815 = vmatpush.bf16.xpose.msra.mxu3 %v1759_v26 }
 0x531   : > { %1804 = vmatpush.bf16.xpose.msrb.mxu2 %v1726_v52 }
 0x534   : > { %1816 = vmatpush.bf16.xpose.msra.mxu3 %v1756_v37 }
 0x539   : > { %1805 = vmatpush.bf16.xpose.msrb.mxu2 %v1723_v50 }
 0x53c   : > { %1817 = vmatpush.bf16.xpose.msra.mxu3 %v1753_v46 }
 0x540   : > { %1984 = vmatmul.msk.bf16.vlgmr.msrb.gmra.mxu2 %vm572_vm2, %v3263_v4 }
 0x544   : > { %1818 = vmatpush.bf16.xpose.msra.mxu3 %v1750_v10 }
 0x54c   : > { %1819 = vmatpush.bf16.xpose.msra.mxu3 %v1747_v17 }
 0x553   : > { %1985 = vmatmul.msk.bf16.vlgmr.msra.gmra.mxu3 %vm572_vm2, %v3263_v4 }
 0x583   : > { %v1779_v11 = vpop.f32.mrf.mxu2 }
 0x584   : > { %v1780_v2 = vadd.f32 %v1779_v11, %v1659_v38 }
 0x586   : > { %v1826_v31 = vadd.f32 %v2278_v33, %v1780_v2 }
 0x588   : > { %1834 = vst [vmem:[%s3342_s17] sm:$0xff] %v1826_v31 }
 0x58b   : > { %v1781_v4 = vpop.f32.mrf.mxu2 }
 0x58c   : > { %v1782_v35 = vadd.f32 %v1781_v4, %v1664_v29 }
 0x58e   : > { %v1830_v9 = vadd.f32 %v2279_v49, %v1782_v35 }
 0x590   : > { %1838 = vst [vmem:[%s3342_s17 + $0x20] sm:$0xff] %v1830_v9 }
 0x596   : > { %v1793_v24 = vpop.f32.mrf.mxu3 }
 0x597   : > { %v1794_v14 = vadd.f32 %v1793_v24, %v1659_v38 }
 0x599   : > { %v1827_v45 = vadd.f32 %v2280_v0, %v1794_v14 }
 0x59b   : > { %1835 = vst [vmem:[%s3342_s17 + $0x8] sm:$0xff] %v1827_v45 }
 0x59e   : > { %v1795_v48 = vpop.f32.mrf.mxu3 }
 0x59f   : > { %v1796_v12 = vadd.f32 %v1795_v48, %v1664_v29 }
 0x5a1   : > { %v1831_v63 = vadd.f32 %v2281_v39, %v1796_v12 }
 0x5a3   : > { %1839 = vst [vmem:[%s3342_s17 + $0x28] sm:$0xff] %v1831_v63 }
 0x5c3   : > { %v1807_v62 = vpop.f32.mrf.mxu2 }
 0x5c4   : > { %v1808_v6 = vadd.f32 %v1807_v62, %v1659_v38 }
 0x5c6   : > { %v1828_v27 = vadd.f32 %v2282_v13, %v1808_v6 }
 0x5c8   : > { %1836 = vst [vmem:[%s3342_s17 + $0x10] sm:$0xff] %v1828_v27 }
 0x5cb   : > { %v1809_v25 = vpop.f32.mrf.mxu2 }
 0x5cc   : > { %v1810_v56 = vadd.f32 %v1809_v25, %v1664_v29 }
 0x5ce   : > { %v1832_v55 = vadd.f32 %v2283_v59, %v1810_v56 }
 0x5d0   : > { %1840 = vst [vmem:[%s3342_s17 + $0x30] sm:$0xff] %v1832_v55 }
 0x5d6   : > { %v1821_v43 = vpop.f32.mrf.mxu3 }
 0x5d7   : > { %v1822_v57 = vadd.f32 %v1821_v43, %v1659_v38 }
 0x5d9   : > { %v1829_v40 = vadd.f32 %v2284_v47, %v1822_v57 }
 0x5db   : > { %1837 = vst [vmem:[%s3342_s17 + $0x18] sm:$0xff] %v1829_v40 }
 0x5de   : > { %v1823_v26 = vpop.f32.mrf.mxu3 }
 0x5df   : > { %v1824_v32 = vadd.f32 %v1823_v26, %v1664_v29 }
 0x5e1   : > { %v1833_v44 = vadd.f32 %v2285_v19, %v1824_v32 }
 0x5e3   : > { %1841 = vst [vmem:[%s3342_s17 + $0x38] sm:$0xff] %v1833_v44 }
 0x5e4 PF: > { %s18_s29 = sadd.s32 1, %s2308_s29   ;;  %s3410_s27 = smov %s2304_s28 }
 0x5e5   : > { %p15_p5 = scmp.ge.s32.totalorder %s18_s29, 4   ;;  %s3411_s28 = smov %s3413_s30 }
 0x5e7   :  { %17 = sbr.rel (!%p15_p5) target bundleno = 2 (0x2), region = 87 }

</bundles_post_ra>
